<compile_context>
chip_gen: v5e
topology: v5e:2x2
jax: 0.10.0
libtpu: 0.0.40
codegen_flags: <defaults>
</compile_context>

<pallas_src>
import functools
import math

import jax
import jax.numpy as jnp
import numpy as np
from jax import lax
from jax.experimental import pallas as pl
from jax.experimental.pallas import tpu as pltpu


def uni_cast_kernel(pc_ref, ft_ref, bias_ref,
                    w1_ref, b1_ref, ln_g_ref, ln_b_ref, w2_ref, b2_ref,
                    wq_ref, bq_ref, wkv_ref, bkv_ref,
                    wo_ref, bo_ref,
                    out_ref, *, n_heads):
    f32 = jnp.float32
    B = bias_ref.shape[0]
    Lk = bias_ref.shape[2]
    D = pc_ref.shape[1]
    Lq = pc_ref.shape[0] // B
    dph = D // n_heads
    scale = 1.0 / math.sqrt(dph)

    # ---- frame_projection over all B*Lk rows: Linear + LayerNorm + ReLU + Linear
    h = jnp.dot(ft_ref[...], w1_ref[...], preferred_element_type=f32) + b1_ref[...]
    mu = jnp.mean(h, axis=-1, keepdims=True)
    var = jnp.mean((h - mu) * (h - mu), axis=-1, keepdims=True)
    h = (h - mu) * lax.rsqrt(var + 1e-5) * ln_g_ref[...] + ln_b_ref[...]
    h = jnp.maximum(h, 0.0)
    ft_proj = jnp.dot(h, w2_ref[...], preferred_element_type=f32) + b2_ref[...]      # (B*Lk, D)

    # ---- q projection + fused k/v projection (weights pre-transposed on host)
    q = jnp.dot(pc_ref[...], wq_ref[...], preferred_element_type=f32) + bq_ref[...]  # (B*Lq, D)
    kv = jnp.dot(ft_proj, wkv_ref[...], preferred_element_type=f32) + bkv_ref[...]   # (B*Lk, 2D)
    k = kv[:, :D]
    v = kv[:, D:]

    q3 = (q * scale).reshape(B, Lq, D)       # tile-aligned split of leading dim
    k3 = k.reshape(B, Lk, D)
    v3 = v.reshape(B, Lk, D)
    bias = bias_ref[...]                     # (B, 1, Lk) additive key-padding bias

    # ---- multi-head cross attention, batched over B per head
    # TODO(synk): attention-weight dropout is omitted (inference / eval mode).
    ctx_cols = []
    for hd in range(n_heads):                # static head count -> unrolled at trace time
        lo = hd * dph
        qh = q3[:, :, lo:lo + dph]           # (B, Lq, dph)
        kh = k3[:, :, lo:lo + dph]           # (B, Lk, dph)
        vh = v3[:, :, lo:lo + dph]           # (B, Lk, dph)
        sc = jnp.einsum("bqd,bkd->bqk", qh, kh,
                        preferred_element_type=f32) + bias          # (B, Lq, Lk)
        m = jnp.max(sc, axis=-1, keepdims=True)
        e = jnp.exp(sc - m)
        denom = jnp.sum(e, axis=-1, keepdims=True)
        w = e * pl.reciprocal(denom, approx=True)                   # softmax (EUP recip)
        ctx_h = jnp.einsum("bqk,bkd->bqd", w, vh,
                           preferred_element_type=f32)              # (B, Lq, dph)
        ctx_cols.append(ctx_h.reshape(B * Lq, dph))
    ctx = jnp.concatenate(ctx_cols, axis=-1)                        # (B*Lq, D)

    out = jnp.dot(ctx, wo_ref[...], preferred_element_type=f32) + bo_ref[...]
    out_ref[...] = out.astype(out_ref.dtype)


def uni_cast_forward(pc_token, frame_token, frame_token_mask, params, n_heads):
    """pc_token: (B, Lq, D); frame_token: (B, Lk, U); frame_token_mask: (B, Lk) bool."""
    B, Lq, D = pc_token.shape
    _, Lk, U = frame_token.shape

    # Host-side layout prep (done once, outside the kernel).
    pc2 = pc_token.reshape(B * Lq, D).astype(jnp.float32)
    ft2 = frame_token.reshape(B * Lk, U).astype(jnp.float32)
    # Additive key-padding bias: 0.0 for valid keys, -1e30 for padding
    # (avoids -inf -> NaN for fully padded rows; identical softmax otherwise).
    bias = jnp.where(frame_token_mask[:, None, :], 0.0, -1e30).astype(jnp.float32)

    tw = lambda n: jnp.asarray(params[n], jnp.float32).T   # (in, out) layout
    vv = lambda n: jnp.asarray(params[n], jnp.float32)

    # Fuse k/v projections into a single (D, 2D) weight / (1, 2D) bias.
    wkv = jnp.concatenate([tw("wk"), tw("wv")], axis=1)
    bkv = jnp.concatenate([vv("bk"), vv("bv")], axis=1)

    args = (pc2, ft2, bias,
            tw("w1"), vv("b1"), vv("ln_g"), vv("ln_b"), tw("w2"), vv("b2"),
            tw("wq"), vv("bq"), wkv, bkv,
            tw("wo"), vv("bo"))

    out2 = pl.pallas_call(
        functools.partial(uni_cast_kernel, n_heads=n_heads),
        out_shape=jax.ShapeDtypeStruct((B * Lq, D), jnp.float32),
        in_specs=[pl.BlockSpec(memory_space=pltpu.MemorySpace.VMEM) for _ in args],
        out_specs=pl.BlockSpec(memory_space=pltpu.MemorySpace.VMEM),
        compiler_params=pltpu.CompilerParams(vmem_limit_bytes=32 << 20),
    )(*args)
    return out2.reshape(B, Lq, D)


def reference_forward(pc_token, frame_token, frame_token_mask, params, n_heads):
    """Pure-JAX reference mirroring the PyTorch module (eval mode)."""
    p = params
    ft = frame_token @ p["w1"].T + p["b1"]
    mu = jnp.mean(ft, axis=-1, keepdims=True)
    var = jnp.mean((ft - mu) ** 2, axis=-1, keepdims=True)
    ft = (ft - mu) / jnp.sqrt(var + 1e-5) * p["ln_g"] + p["ln_b"]
    ft = jnp.maximum(ft, 0.0)
    ft = ft @ p["w2"].T + p["b2"]

    B, Lq, D = pc_token.shape
    Lk = ft.shape[1]
    dph = D // n_heads
    q = (pc_token @ p["wq"].T + p["bq"]).reshape(B, Lq, n_heads, dph).transpose(0, 2, 1, 3)
    k = (ft @ p["wk"].T + p["bk"]).reshape(B, Lk, n_heads, dph).transpose(0, 2, 1, 3)
    v = (ft @ p["wv"].T + p["bv"]).reshape(B, Lk, n_heads, dph).transpose(0, 2, 1, 3)
    q = q / math.sqrt(dph)
    scores = jnp.einsum("bhqd,bhkd->bhqk", q, k)
    keep = frame_token_mask[:, None, None, :]
    scores = jnp.where(keep, scores, -jnp.inf)
    w = jax.nn.softmax(scores, axis=-1)
    ctx = jnp.einsum("bhqk,bhkd->bhqd", w, v)
    ctx = ctx.transpose(0, 2, 1, 3).reshape(B, Lq, D)
    return ctx @ p["wo"].T + p["bo"]


def init_params(key, updim, downdim):
    ks = jax.random.split(key, 8)

    def lin(k, out_f, in_f):
        bound = 1.0 / math.sqrt(in_f)
        kw, kb = jax.random.split(k)
        w = jax.random.uniform(kw, (out_f, in_f), jnp.float32, -bound, bound)
        b = jax.random.uniform(kb, (1, out_f), jnp.float32, -bound, bound)
        return w, b

    w1, b1 = lin(ks[0], downdim, updim)
    w2, b2 = lin(ks[1], downdim, downdim)
    wq, bq = lin(ks[2], downdim, downdim)
    wk, bk = lin(ks[3], downdim, downdim)
    wv, bv = lin(ks[4], downdim, downdim)
    wo, bo = lin(ks[5], downdim, downdim)
    return {
        "w1": w1, "b1": b1,
        "ln_g": jnp.ones((1, downdim), jnp.float32),
        "ln_b": jnp.zeros((1, downdim), jnp.float32),
        "w2": w2, "b2": b2,
        "wq": wq, "bq": bq, "wk": wk, "bk": bk, "wv": wv, "bv": bv,
        "wo": wo, "bo": bo,
    }


if __name__ == "__main__":
    # Small but lane-dense shapes consistent with the module
    # (updim -> downdim projection, multi-head cross attention).
    B, Lq, Lk = 2, 8, 8
    updim, downdim, n_heads = 256, 128, 8

    key = jax.random.PRNGKey(0)
    k_pc, k_ft, k_params = jax.random.split(key, 3)

    pc_token = jax.random.normal(k_pc, (B, Lq, downdim), jnp.float32)
    frame_token = jax.random.normal(k_ft, (B, Lk, updim), jnp.float32)
    # key_padding_mask: True = valid key (PyTorch fills ~mask positions with -inf)
    frame_token_mask = jnp.ones((B, Lk), dtype=bool)
    frame_token_mask = frame_token_mask.at[1, Lk - 2:].set(False)  # pad last 2 keys of batch 1

    params = init_params(k_params, updim, downdim)

    out = uni_cast_forward(pc_token, frame_token, frame_token_mask, params, n_heads)
    out = jax.block_until_ready(out)

    ref = reference_forward(pc_token, frame_token, frame_token_mask, params, n_heads)
    # Tolerance leaves headroom for the approximate (EUP) softmax reciprocal.
    assert np.allclose(np.asarray(out), np.asarray(ref), atol=2e-3, rtol=2e-3)

    print("KERNEL_OK")
</pallas_src>

<mosaic_0001>
module attributes {stable_mosaic.version = 11 : i64} {
  func.func @uni_cast_kernel(%arg0: memref<16x128xf32, #tpu.memory_space<vmem>>, %arg1: memref<16x256xf32, #tpu.memory_space<vmem>>, %arg2: memref<2x1x8xf32, #tpu.memory_space<vmem>>, %arg3: memref<256x128xf32, #tpu.memory_space<vmem>>, %arg4: memref<1x128xf32, #tpu.memory_space<vmem>>, %arg5: memref<1x128xf32, #tpu.memory_space<vmem>>, %arg6: memref<1x128xf32, #tpu.memory_space<vmem>>, %arg7: memref<128x128xf32, #tpu.memory_space<vmem>>, %arg8: memref<1x128xf32, #tpu.memory_space<vmem>>, %arg9: memref<128x128xf32, #tpu.memory_space<vmem>>, %arg10: memref<1x128xf32, #tpu.memory_space<vmem>>, %arg11: memref<128x256xf32, #tpu.memory_space<vmem>>, %arg12: memref<1x256xf32, #tpu.memory_space<vmem>>, %arg13: memref<128x128xf32, #tpu.memory_space<vmem>>, %arg14: memref<1x128xf32, #tpu.memory_space<vmem>>, %arg15: memref<16x128xf32, #tpu.memory_space<vmem>>) attributes {dimension_semantics = [], scalar_prefetch = 0 : i64, scratch_operands = 0 : i64, tpu.core_type = #tpu.core_type<tc>} {
    %c0 = arith.constant 0 : index
    %c0_0 = arith.constant 0 : index
    %0 = vector.load %arg1[%c0, %c0_0] : memref<16x256xf32, #tpu.memory_space<vmem>>, vector<16x256xf32>
    %c0_1 = arith.constant 0 : index
    %c0_2 = arith.constant 0 : index
    %1 = vector.load %arg3[%c0_1, %c0_2] : memref<256x128xf32, #tpu.memory_space<vmem>>, vector<256x128xf32>
    %cst = arith.constant dense<0.000000e+00> : vector<16x128xf32>
    %2 = tpu.matmul %0, %1, %cst {dimension_numbers = #tpu.dot_dimension_numbers<[1], [0], [0], [1], [0, 0, 1, 1], [], []>} : vector<16x256xf32>, vector<256x128xf32>, vector<16x128xf32> -> vector<16x128xf32>
    %c0_3 = arith.constant 0 : index
    %c0_4 = arith.constant 0 : index
    %3 = vector.load %arg4[%c0_3, %c0_4] : memref<1x128xf32, #tpu.memory_space<vmem>>, vector<1x128xf32>
    %4 = vector.broadcast %3 : vector<1x128xf32> to vector<16x128xf32>
    %5 = arith.addf %2, %4 : vector<16x128xf32>
    %cst_5 = arith.constant dense<0.000000e+00> : vector<16xf32>
    %6 = vector.multi_reduction <add>, %5, %cst_5 [1] : vector<16x128xf32> to vector<16xf32>
    %7 = vector.shape_cast %6 : vector<16xf32> to vector<16x1xf32>
    %cst_6 = arith.constant 1.280000e+02 : f32
    %8 = vector.broadcast %cst_6 : f32 to vector<16x1xf32>
    %9 = arith.divf %7, %8 : vector<16x1xf32>
    %10 = vector.broadcast %9 : vector<16x1xf32> to vector<16x128xf32>
    %11 = arith.subf %5, %10 : vector<16x128xf32>
    %12 = vector.broadcast %9 : vector<16x1xf32> to vector<16x128xf32>
    %13 = arith.subf %5, %12 : vector<16x128xf32>
    %14 = arith.mulf %11, %13 : vector<16x128xf32>
    %cst_7 = arith.constant dense<0.000000e+00> : vector<16xf32>
    %15 = vector.multi_reduction <add>, %14, %cst_7 [1] : vector<16x128xf32> to vector<16xf32>
    %16 = vector.shape_cast %15 : vector<16xf32> to vector<16x1xf32>
    %cst_8 = arith.constant 1.280000e+02 : f32
    %17 = vector.broadcast %cst_8 : f32 to vector<16x1xf32>
    %18 = arith.divf %16, %17 : vector<16x1xf32>
    %19 = vector.broadcast %9 : vector<16x1xf32> to vector<16x128xf32>
    %20 = arith.subf %5, %19 : vector<16x128xf32>
    %cst_9 = arith.constant 9.99999974E-6 : f32
    %21 = vector.broadcast %cst_9 : f32 to vector<16x1xf32>
    %22 = arith.addf %18, %21 : vector<16x1xf32>
    %23 = math.rsqrt %22 : vector<16x1xf32>
    %24 = vector.broadcast %23 : vector<16x1xf32> to vector<16x128xf32>
    %25 = arith.mulf %20, %24 : vector<16x128xf32>
    %c0_10 = arith.constant 0 : index
    %c0_11 = arith.constant 0 : index
    %26 = vector.load %arg5[%c0_10, %c0_11] : memref<1x128xf32, #tpu.memory_space<vmem>>, vector<1x128xf32>
    %27 = vector.broadcast %26 : vector<1x128xf32> to vector<16x128xf32>
    %28 = arith.mulf %25, %27 : vector<16x128xf32>
    %c0_12 = arith.constant 0 : index
    %c0_13 = arith.constant 0 : index
    %29 = vector.load %arg6[%c0_12, %c0_13] : memref<1x128xf32, #tpu.memory_space<vmem>>, vector<1x128xf32>
    %30 = vector.broadcast %29 : vector<1x128xf32> to vector<16x128xf32>
    %31 = arith.addf %28, %30 : vector<16x128xf32>
    %cst_14 = arith.constant 0.000000e+00 : f32
    %32 = vector.broadcast %cst_14 : f32 to vector<16x128xf32>
    %33 = arith.maximumf %31, %32 : vector<16x128xf32>
    %c0_15 = arith.constant 0 : index
    %c0_16 = arith.constant 0 : index
    %34 = vector.load %arg7[%c0_15, %c0_16] : memref<128x128xf32, #tpu.memory_space<vmem>>, vector<128x128xf32>
    %cst_17 = arith.constant dense<0.000000e+00> : vector<16x128xf32>
    %35 = tpu.matmul %33, %34, %cst_17 {dimension_numbers = #tpu.dot_dimension_numbers<[1], [0], [0], [1], [0, 0, 1, 1], [], []>} : vector<16x128xf32>, vector<128x128xf32>, vector<16x128xf32> -> vector<16x128xf32>
    %c0_18 = arith.constant 0 : index
    %c0_19 = arith.constant 0 : index
    %36 = vector.load %arg8[%c0_18, %c0_19] : memref<1x128xf32, #tpu.memory_space<vmem>>, vector<1x128xf32>
    %37 = vector.broadcast %36 : vector<1x128xf32> to vector<16x128xf32>
    %38 = arith.addf %35, %37 : vector<16x128xf32>
    %c0_20 = arith.constant 0 : index
    %c0_21 = arith.constant 0 : index
    %39 = vector.load %arg0[%c0_20, %c0_21] : memref<16x128xf32, #tpu.memory_space<vmem>>, vector<16x128xf32>
    %c0_22 = arith.constant 0 : index
    %c0_23 = arith.constant 0 : index
    %40 = vector.load %arg9[%c0_22, %c0_23] : memref<128x128xf32, #tpu.memory_space<vmem>>, vector<128x128xf32>
    %cst_24 = arith.constant dense<0.000000e+00> : vector<16x128xf32>
    %41 = tpu.matmul %39, %40, %cst_24 {dimension_numbers = #tpu.dot_dimension_numbers<[1], [0], [0], [1], [0, 0, 1, 1], [], []>} : vector<16x128xf32>, vector<128x128xf32>, vector<16x128xf32> -> vector<16x128xf32>
    %c0_25 = arith.constant 0 : index
    %c0_26 = arith.constant 0 : index
    %42 = vector.load %arg10[%c0_25, %c0_26] : memref<1x128xf32, #tpu.memory_space<vmem>>, vector<1x128xf32>
    %43 = vector.broadcast %42 : vector<1x128xf32> to vector<16x128xf32>
    %44 = arith.addf %41, %43 : vector<16x128xf32>
    %c0_27 = arith.constant 0 : index
    %c0_28 = arith.constant 0 : index
    %45 = vector.load %arg11[%c0_27, %c0_28] : memref<128x256xf32, #tpu.memory_space<vmem>>, vector<128x256xf32>
    %cst_29 = arith.constant dense<0.000000e+00> : vector<16x256xf32>
    %46 = tpu.matmul %38, %45, %cst_29 {dimension_numbers = #tpu.dot_dimension_numbers<[1], [0], [0], [1], [0, 0, 1, 1], [], []>} : vector<16x128xf32>, vector<128x256xf32>, vector<16x256xf32> -> vector<16x256xf32>
    %c0_30 = arith.constant 0 : index
    %c0_31 = arith.constant 0 : index
    %47 = vector.load %arg12[%c0_30, %c0_31] : memref<1x256xf32, #tpu.memory_space<vmem>>, vector<1x256xf32>
    %48 = vector.broadcast %47 : vector<1x256xf32> to vector<16x256xf32>
    %49 = arith.addf %46, %48 : vector<16x256xf32>
    %50 = vector.extract_strided_slice %49 {offsets = [0, 0], sizes = [16, 128], strides = [1, 1]} : vector<16x256xf32> to vector<16x128xf32>
    %51 = vector.extract_strided_slice %49 {offsets = [0, 128], sizes = [16, 128], strides = [1, 1]} : vector<16x256xf32> to vector<16x128xf32>
    %cst_32 = arith.constant 2.500000e-01 : f32
    %52 = vector.broadcast %cst_32 : f32 to vector<16x128xf32>
    %53 = arith.mulf %44, %52 : vector<16x128xf32>
    %54 = vector.shape_cast %53 : vector<16x128xf32> to vector<2x8x128xf32>
    %55 = vector.shape_cast %50 : vector<16x128xf32> to vector<2x8x128xf32>
    %56 = vector.shape_cast %51 : vector<16x128xf32> to vector<2x8x128xf32>
    %c0_33 = arith.constant 0 : index
    %c0_34 = arith.constant 0 : index
    %c0_35 = arith.constant 0 : index
    %57 = vector.load %arg2[%c0_33, %c0_34, %c0_35] : memref<2x1x8xf32, #tpu.memory_space<vmem>>, vector<2x1x8xf32>
    %58 = vector.extract_strided_slice %54 {offsets = [0, 0, 0], sizes = [2, 8, 16], strides = [1, 1, 1]} : vector<2x8x128xf32> to vector<2x8x16xf32>
    %59 = vector.extract_strided_slice %55 {offsets = [0, 0, 0], sizes = [2, 8, 16], strides = [1, 1, 1]} : vector<2x8x128xf32> to vector<2x8x16xf32>
    %60 = vector.extract_strided_slice %56 {offsets = [0, 0, 0], sizes = [2, 8, 16], strides = [1, 1, 1]} : vector<2x8x128xf32> to vector<2x8x16xf32>
    "tpu.trace_start"() <{level = 10 : i32, message = "bqd,bkd->bqk"}> : () -> ()
    %cst_36 = arith.constant dense<0.000000e+00> : vector<2x8x8xf32>
    %61 = tpu.matmul %58, %59, %cst_36 {dimension_numbers = #tpu.dot_dimension_numbers<[2], [2], [1], [1], [0, 0, 0, 1, 1, 1], [0], [0]>} : vector<2x8x16xf32>, vector<2x8x16xf32>, vector<2x8x8xf32> -> vector<2x8x8xf32>
    "tpu.trace_stop"() : () -> ()
    %62 = vector.broadcast %57 : vector<2x1x8xf32> to vector<2x8x8xf32>
    %63 = arith.addf %61, %62 : vector<2x8x8xf32>
    %cst_37 = arith.constant dense<0xFF800000> : vector<2x8xf32>
    %64 = vector.multi_reduction <maximumf>, %63, %cst_37 [2] : vector<2x8x8xf32> to vector<2x8xf32>
    %65 = vector.shape_cast %64 : vector<2x8xf32> to vector<2x8x1xf32>
    %66 = vector.broadcast %65 : vector<2x8x1xf32> to vector<2x8x8xf32>
    %67 = arith.subf %63, %66 : vector<2x8x8xf32>
    %68 = math.exp %67 : vector<2x8x8xf32>
    %cst_38 = arith.constant dense<0.000000e+00> : vector<2x8xf32>
    %69 = vector.multi_reduction <add>, %68, %cst_38 [2] : vector<2x8x8xf32> to vector<2x8xf32>
    %70 = vector.shape_cast %69 : vector<2x8xf32> to vector<2x8x1xf32>
    %71 = tpu.reciprocal %70 {approx = true} : vector<2x8x1xf32> -> vector<2x8x1xf32>
    %72 = vector.broadcast %71 : vector<2x8x1xf32> to vector<2x8x8xf32>
    %73 = arith.mulf %68, %72 : vector<2x8x8xf32>
    "tpu.trace_start"() <{level = 10 : i32, message = "bqk,bkd->bqd"}> : () -> ()
    %cst_39 = arith.constant dense<0.000000e+00> : vector<2x8x16xf32>
    %74 = tpu.matmul %73, %60, %cst_39 {dimension_numbers = #tpu.dot_dimension_numbers<[2], [1], [1], [2], [0, 0, 0, 1, 1, 2], [0], [0]>} : vector<2x8x8xf32>, vector<2x8x16xf32>, vector<2x8x16xf32> -> vector<2x8x16xf32>
    "tpu.trace_stop"() : () -> ()
    %75 = vector.shape_cast %74 : vector<2x8x16xf32> to vector<16x16xf32>
    %76 = vector.extract_strided_slice %54 {offsets = [0, 0, 16], sizes = [2, 8, 16], strides = [1, 1, 1]} : vector<2x8x128xf32> to vector<2x8x16xf32>
    %77 = vector.extract_strided_slice %55 {offsets = [0, 0, 16], sizes = [2, 8, 16], strides = [1, 1, 1]} : vector<2x8x128xf32> to vector<2x8x16xf32>
    %78 = vector.extract_strided_slice %56 {offsets = [0, 0, 16], sizes = [2, 8, 16], strides = [1, 1, 1]} : vector<2x8x128xf32> to vector<2x8x16xf32>
    "tpu.trace_start"() <{level = 10 : i32, message = "bqd,bkd->bqk"}> : () -> ()
    %cst_40 = arith.constant dense<0.000000e+00> : vector<2x8x8xf32>
    %79 = tpu.matmul %76, %77, %cst_40 {dimension_numbers = #tpu.dot_dimension_numbers<[2], [2], [1], [1], [0, 0, 0, 1, 1, 1], [0], [0]>} : vector<2x8x16xf32>, vector<2x8x16xf32>, vector<2x8x8xf32> -> vector<2x8x8xf32>
    "tpu.trace_stop"() : () -> ()
    %80 = vector.broadcast %57 : vector<2x1x8xf32> to vector<2x8x8xf32>
    %81 = arith.addf %79, %80 : vector<2x8x8xf32>
    %cst_41 = arith.constant dense<0xFF800000> : vector<2x8xf32>
    %82 = vector.multi_reduction <maximumf>, %81, %cst_41 [2] : vector<2x8x8xf32> to vector<2x8xf32>
    %83 = vector.shape_cast %82 : vector<2x8xf32> to vector<2x8x1xf32>
    %84 = vector.broadcast %83 : vector<2x8x1xf32> to vector<2x8x8xf32>
    %85 = arith.subf %81, %84 : vector<2x8x8xf32>
    %86 = math.exp %85 : vector<2x8x8xf32>
    %cst_42 = arith.constant dense<0.000000e+00> : vector<2x8xf32>
    %87 = vector.multi_reduction <add>, %86, %cst_42 [2] : vector<2x8x8xf32> to vector<2x8xf32>
    %88 = vector.shape_cast %87 : vector<2x8xf32> to vector<2x8x1xf32>
    %89 = tpu.reciprocal %88 {approx = true} : vector<2x8x1xf32> -> vector<2x8x1xf32>
    %90 = vector.broadcast %89 : vector<2x8x1xf32> to vector<2x8x8xf32>
    %91 = arith.mulf %86, %90 : vector<2x8x8xf32>
    "tpu.trace_start"() <{level = 10 : i32, message = "bqk,bkd->bqd"}> : () -> ()
    %cst_43 = arith.constant dense<0.000000e+00> : vector<2x8x16xf32>
    %92 = tpu.matmul %91, %78, %cst_43 {dimension_numbers = #tpu.dot_dimension_numbers<[2], [1], [1], [2], [0, 0, 0, 1, 1, 2], [0], [0]>} : vector<2x8x8xf32>, vector<2x8x16xf32>, vector<2x8x16xf32> -> vector<2x8x16xf32>
    "tpu.trace_stop"() : () -> ()
    %93 = vector.shape_cast %92 : vector<2x8x16xf32> to vector<16x16xf32>
    %94 = vector.extract_strided_slice %54 {offsets = [0, 0, 32], sizes = [2, 8, 16], strides = [1, 1, 1]} : vector<2x8x128xf32> to vector<2x8x16xf32>
    %95 = vector.extract_strided_slice %55 {offsets = [0, 0, 32], sizes = [2, 8, 16], strides = [1, 1, 1]} : vector<2x8x128xf32> to vector<2x8x16xf32>
    %96 = vector.extract_strided_slice %56 {offsets = [0, 0, 32], sizes = [2, 8, 16], strides = [1, 1, 1]} : vector<2x8x128xf32> to vector<2x8x16xf32>
    "tpu.trace_start"() <{level = 10 : i32, message = "bqd,bkd->bqk"}> : () -> ()
    %cst_44 = arith.constant dense<0.000000e+00> : vector<2x8x8xf32>
    %97 = tpu.matmul %94, %95, %cst_44 {dimension_numbers = #tpu.dot_dimension_numbers<[2], [2], [1], [1], [0, 0, 0, 1, 1, 1], [0], [0]>} : vector<2x8x16xf32>, vector<2x8x16xf32>, vector<2x8x8xf32> -> vector<2x8x8xf32>
    "tpu.trace_stop"() : () -> ()
    %98 = vector.broadcast %57 : vector<2x1x8xf32> to vector<2x8x8xf32>
    %99 = arith.addf %97, %98 : vector<2x8x8xf32>
    %cst_45 = arith.constant dense<0xFF800000> : vector<2x8xf32>
    %100 = vector.multi_reduction <maximumf>, %99, %cst_45 [2] : vector<2x8x8xf32> to vector<2x8xf32>
    %101 = vector.shape_cast %100 : vector<2x8xf32> to vector<2x8x1xf32>
    %102 = vector.broadcast %101 : vector<2x8x1xf32> to vector<2x8x8xf32>
    %103 = arith.subf %99, %102 : vector<2x8x8xf32>
    %104 = math.exp %103 : vector<2x8x8xf32>
    %cst_46 = arith.constant dense<0.000000e+00> : vector<2x8xf32>
    %105 = vector.multi_reduction <add>, %104, %cst_46 [2] : vector<2x8x8xf32> to vector<2x8xf32>
    %106 = vector.shape_cast %105 : vector<2x8xf32> to vector<2x8x1xf32>
    %107 = tpu.reciprocal %106 {approx = true} : vector<2x8x1xf32> -> vector<2x8x1xf32>
    %108 = vector.broadcast %107 : vector<2x8x1xf32> to vector<2x8x8xf32>
    %109 = arith.mulf %104, %108 : vector<2x8x8xf32>
    "tpu.trace_start"() <{level = 10 : i32, message = "bqk,bkd->bqd"}> : () -> ()
    %cst_47 = arith.constant dense<0.000000e+00> : vector<2x8x16xf32>
    %110 = tpu.matmul %109, %96, %cst_47 {dimension_numbers = #tpu.dot_dimension_numbers<[2], [1], [1], [2], [0, 0, 0, 1, 1, 2], [0], [0]>} : vector<2x8x8xf32>, vector<2x8x16xf32>, vector<2x8x16xf32> -> vector<2x8x16xf32>
    "tpu.trace_stop"() : () -> ()
    %111 = vector.shape_cast %110 : vector<2x8x16xf32> to vector<16x16xf32>
    %112 = vector.extract_strided_slice %54 {offsets = [0, 0, 48], sizes = [2, 8, 16], strides = [1, 1, 1]} : vector<2x8x128xf32> to vector<2x8x16xf32>
    %113 = vector.extract_strided_slice %55 {offsets = [0, 0, 48], sizes = [2, 8, 16], strides = [1, 1, 1]} : vector<2x8x128xf32> to vector<2x8x16xf32>
    %114 = vector.extract_strided_slice %56 {offsets = [0, 0, 48], sizes = [2, 8, 16], strides = [1, 1, 1]} : vector<2x8x128xf32> to vector<2x8x16xf32>
    "tpu.trace_start"() <{level = 10 : i32, message = "bqd,bkd->bqk"}> : () -> ()
    %cst_48 = arith.constant dense<0.000000e+00> : vector<2x8x8xf32>
    %115 = tpu.matmul %112, %113, %cst_48 {dimension_numbers = #tpu.dot_dimension_numbers<[2], [2], [1], [1], [0, 0, 0, 1, 1, 1], [0], [0]>} : vector<2x8x16xf32>, vector<2x8x16xf32>, vector<2x8x8xf32> -> vector<2x8x8xf32>
    "tpu.trace_stop"() : () -> ()
    %116 = vector.broadcast %57 : vector<2x1x8xf32> to vector<2x8x8xf32>
    %117 = arith.addf %115, %116 : vector<2x8x8xf32>
    %cst_49 = arith.constant dense<0xFF800000> : vector<2x8xf32>
    %118 = vector.multi_reduction <maximumf>, %117, %cst_49 [2] : vector<2x8x8xf32> to vector<2x8xf32>
    %119 = vector.shape_cast %118 : vector<2x8xf32> to vector<2x8x1xf32>
    %120 = vector.broadcast %119 : vector<2x8x1xf32> to vector<2x8x8xf32>
    %121 = arith.subf %117, %120 : vector<2x8x8xf32>
    %122 = math.exp %121 : vector<2x8x8xf32>
    %cst_50 = arith.constant dense<0.000000e+00> : vector<2x8xf32>
    %123 = vector.multi_reduction <add>, %122, %cst_50 [2] : vector<2x8x8xf32> to vector<2x8xf32>
    %124 = vector.shape_cast %123 : vector<2x8xf32> to vector<2x8x1xf32>
    %125 = tpu.reciprocal %124 {approx = true} : vector<2x8x1xf32> -> vector<2x8x1xf32>
    %126 = vector.broadcast %125 : vector<2x8x1xf32> to vector<2x8x8xf32>
    %127 = arith.mulf %122, %126 : vector<2x8x8xf32>
    "tpu.trace_start"() <{level = 10 : i32, message = "bqk,bkd->bqd"}> : () -> ()
    %cst_51 = arith.constant dense<0.000000e+00> : vector<2x8x16xf32>
    %128 = tpu.matmul %127, %114, %cst_51 {dimension_numbers = #tpu.dot_dimension_numbers<[2], [1], [1], [2], [0, 0, 0, 1, 1, 2], [0], [0]>} : vector<2x8x8xf32>, vector<2x8x16xf32>, vector<2x8x16xf32> -> vector<2x8x16xf32>
    "tpu.trace_stop"() : () -> ()
    %129 = vector.shape_cast %128 : vector<2x8x16xf32> to vector<16x16xf32>
    %130 = vector.extract_strided_slice %54 {offsets = [0, 0, 64], sizes = [2, 8, 16], strides = [1, 1, 1]} : vector<2x8x128xf32> to vector<2x8x16xf32>
    %131 = vector.extract_strided_slice %55 {offsets = [0, 0, 64], sizes = [2, 8, 16], strides = [1, 1, 1]} : vector<2x8x128xf32> to vector<2x8x16xf32>
    %132 = vector.extract_strided_slice %56 {offsets = [0, 0, 64], sizes = [2, 8, 16], strides = [1, 1, 1]} : vector<2x8x128xf32> to vector<2x8x16xf32>
    "tpu.trace_start"() <{level = 10 : i32, message = "bqd,bkd->bqk"}> : () -> ()
    %cst_52 = arith.constant dense<0.000000e+00> : vector<2x8x8xf32>
    %133 = tpu.matmul %130, %131, %cst_52 {dimension_numbers = #tpu.dot_dimension_numbers<[2], [2], [1], [1], [0, 0, 0, 1, 1, 1], [0], [0]>} : vector<2x8x16xf32>, vector<2x8x16xf32>, vector<2x8x8xf32> -> vector<2x8x8xf32>
    "tpu.trace_stop"() : () -> ()
    %134 = vector.broadcast %57 : vector<2x1x8xf32> to vector<2x8x8xf32>
    %135 = arith.addf %133, %134 : vector<2x8x8xf32>
    %cst_53 = arith.constant dense<0xFF800000> : vector<2x8xf32>
    %136 = vector.multi_reduction <maximumf>, %135, %cst_53 [2] : vector<2x8x8xf32> to vector<2x8xf32>
    %137 = vector.shape_cast %136 : vector<2x8xf32> to vector<2x8x1xf32>
    %138 = vector.broadcast %137 : vector<2x8x1xf32> to vector<2x8x8xf32>
    %139 = arith.subf %135, %138 : vector<2x8x8xf32>
    %140 = math.exp %139 : vector<2x8x8xf32>
    %cst_54 = arith.constant dense<0.000000e+00> : vector<2x8xf32>
    %141 = vector.multi_reduction <add>, %140, %cst_54 [2] : vector<2x8x8xf32> to vector<2x8xf32>
    %142 = vector.shape_cast %141 : vector<2x8xf32> to vector<2x8x1xf32>
    %143 = tpu.reciprocal %142 {approx = true} : vector<2x8x1xf32> -> vector<2x8x1xf32>
    %144 = vector.broadcast %143 : vector<2x8x1xf32> to vector<2x8x8xf32>
    %145 = arith.mulf %140, %144 : vector<2x8x8xf32>
    "tpu.trace_start"() <{level = 10 : i32, message = "bqk,bkd->bqd"}> : () -> ()
    %cst_55 = arith.constant dense<0.000000e+00> : vector<2x8x16xf32>
    %146 = tpu.matmul %145, %132, %cst_55 {dimension_numbers = #tpu.dot_dimension_numbers<[2], [1], [1], [2], [0, 0, 0, 1, 1, 2], [0], [0]>} : vector<2x8x8xf32>, vector<2x8x16xf32>, vector<2x8x16xf32> -> vector<2x8x16xf32>
    "tpu.trace_stop"() : () -> ()
    %147 = vector.shape_cast %146 : vector<2x8x16xf32> to vector<16x16xf32>
    %148 = vector.extract_strided_slice %54 {offsets = [0, 0, 80], sizes = [2, 8, 16], strides = [1, 1, 1]} : vector<2x8x128xf32> to vector<2x8x16xf32>
    %149 = vector.extract_strided_slice %55 {offsets = [0, 0, 80], sizes = [2, 8, 16], strides = [1, 1, 1]} : vector<2x8x128xf32> to vector<2x8x16xf32>
    %150 = vector.extract_strided_slice %56 {offsets = [0, 0, 80], sizes = [2, 8, 16], strides = [1, 1, 1]} : vector<2x8x128xf32> to vector<2x8x16xf32>
    "tpu.trace_start"() <{level = 10 : i32, message = "bqd,bkd->bqk"}> : () -> ()
    %cst_56 = arith.constant dense<0.000000e+00> : vector<2x8x8xf32>
    %151 = tpu.matmul %148, %149, %cst_56 {dimension_numbers = #tpu.dot_dimension_numbers<[2], [2], [1], [1], [0, 0, 0, 1, 1, 1], [0], [0]>} : vector<2x8x16xf32>, vector<2x8x16xf32>, vector<2x8x8xf32> -> vector<2x8x8xf32>
    "tpu.trace_stop"() : () -> ()
    %152 = vector.broadcast %57 : vector<2x1x8xf32> to vector<2x8x8xf32>
    %153 = arith.addf %151, %152 : vector<2x8x8xf32>
    %cst_57 = arith.constant dense<0xFF800000> : vector<2x8xf32>
    %154 = vector.multi_reduction <maximumf>, %153, %cst_57 [2] : vector<2x8x8xf32> to vector<2x8xf32>
    %155 = vector.shape_cast %154 : vector<2x8xf32> to vector<2x8x1xf32>
    %156 = vector.broadcast %155 : vector<2x8x1xf32> to vector<2x8x8xf32>
    %157 = arith.subf %153, %156 : vector<2x8x8xf32>
    %158 = math.exp %157 : vector<2x8x8xf32>
    %cst_58 = arith.constant dense<0.000000e+00> : vector<2x8xf32>
    %159 = vector.multi_reduction <add>, %158, %cst_58 [2] : vector<2x8x8xf32> to vector<2x8xf32>
    %160 = vector.shape_cast %159 : vector<2x8xf32> to vector<2x8x1xf32>
    %161 = tpu.reciprocal %160 {approx = true} : vector<2x8x1xf32> -> vector<2x8x1xf32>
    %162 = vector.broadcast %161 : vector<2x8x1xf32> to vector<2x8x8xf32>
    %163 = arith.mulf %158, %162 : vector<2x8x8xf32>
    "tpu.trace_start"() <{level = 10 : i32, message = "bqk,bkd->bqd"}> : () -> ()
    %cst_59 = arith.constant dense<0.000000e+00> : vector<2x8x16xf32>
    %164 = tpu.matmul %163, %150, %cst_59 {dimension_numbers = #tpu.dot_dimension_numbers<[2], [1], [1], [2], [0, 0, 0, 1, 1, 2], [0], [0]>} : vector<2x8x8xf32>, vector<2x8x16xf32>, vector<2x8x16xf32> -> vector<2x8x16xf32>
    "tpu.trace_stop"() : () -> ()
    %165 = vector.shape_cast %164 : vector<2x8x16xf32> to vector<16x16xf32>
    %166 = vector.extract_strided_slice %54 {offsets = [0, 0, 96], sizes = [2, 8, 16], strides = [1, 1, 1]} : vector<2x8x128xf32> to vector<2x8x16xf32>
    %167 = vector.extract_strided_slice %55 {offsets = [0, 0, 96], sizes = [2, 8, 16], strides = [1, 1, 1]} : vector<2x8x128xf32> to vector<2x8x16xf32>
    %168 = vector.extract_strided_slice %56 {offsets = [0, 0, 96], sizes = [2, 8, 16], strides = [1, 1, 1]} : vector<2x8x128xf32> to vector<2x8x16xf32>
    "tpu.trace_start"() <{level = 10 : i32, message = "bqd,bkd->bqk"}> : () -> ()
    %cst_60 = arith.constant dense<0.000000e+00> : vector<2x8x8xf32>
    %169 = tpu.matmul %166, %167, %cst_60 {dimension_numbers = #tpu.dot_dimension_numbers<[2], [2], [1], [1], [0, 0, 0, 1, 1, 1], [0], [0]>} : vector<2x8x16xf32>, vector<2x8x16xf32>, vector<2x8x8xf32> -> vector<2x8x8xf32>
    "tpu.trace_stop"() : () -> ()
    %170 = vector.broadcast %57 : vector<2x1x8xf32> to vector<2x8x8xf32>
    %171 = arith.addf %169, %170 : vector<2x8x8xf32>
    %cst_61 = arith.constant dense<0xFF800000> : vector<2x8xf32>
    %172 = vector.multi_reduction <maximumf>, %171, %cst_61 [2] : vector<2x8x8xf32> to vector<2x8xf32>
    %173 = vector.shape_cast %172 : vector<2x8xf32> to vector<2x8x1xf32>
    %174 = vector.broadcast %173 : vector<2x8x1xf32> to vector<2x8x8xf32>
    %175 = arith.subf %171, %174 : vector<2x8x8xf32>
    %176 = math.exp %175 : vector<2x8x8xf32>
    %cst_62 = arith.constant dense<0.000000e+00> : vector<2x8xf32>
    %177 = vector.multi_reduction <add>, %176, %cst_62 [2] : vector<2x8x8xf32> to vector<2x8xf32>
    %178 = vector.shape_cast %177 : vector<2x8xf32> to vector<2x8x1xf32>
    %179 = tpu.reciprocal %178 {approx = true} : vector<2x8x1xf32> -> vector<2x8x1xf32>
    %180 = vector.broadcast %179 : vector<2x8x1xf32> to vector<2x8x8xf32>
    %181 = arith.mulf %176, %180 : vector<2x8x8xf32>
    "tpu.trace_start"() <{level = 10 : i32, message = "bqk,bkd->bqd"}> : () -> ()
    %cst_63 = arith.constant dense<0.000000e+00> : vector<2x8x16xf32>
    %182 = tpu.matmul %181, %168, %cst_63 {dimension_numbers = #tpu.dot_dimension_numbers<[2], [1], [1], [2], [0, 0, 0, 1, 1, 2], [0], [0]>} : vector<2x8x8xf32>, vector<2x8x16xf32>, vector<2x8x16xf32> -> vector<2x8x16xf32>
    "tpu.trace_stop"() : () -> ()
    %183 = vector.shape_cast %182 : vector<2x8x16xf32> to vector<16x16xf32>
    %184 = vector.extract_strided_slice %54 {offsets = [0, 0, 112], sizes = [2, 8, 16], strides = [1, 1, 1]} : vector<2x8x128xf32> to vector<2x8x16xf32>
    %185 = vector.extract_strided_slice %55 {offsets = [0, 0, 112], sizes = [2, 8, 16], strides = [1, 1, 1]} : vector<2x8x128xf32> to vector<2x8x16xf32>
    %186 = vector.extract_strided_slice %56 {offsets = [0, 0, 112], sizes = [2, 8, 16], strides = [1, 1, 1]} : vector<2x8x128xf32> to vector<2x8x16xf32>
    "tpu.trace_start"() <{level = 10 : i32, message = "bqd,bkd->bqk"}> : () -> ()
    %cst_64 = arith.constant dense<0.000000e+00> : vector<2x8x8xf32>
    %187 = tpu.matmul %184, %185, %cst_64 {dimension_numbers = #tpu.dot_dimension_numbers<[2], [2], [1], [1], [0, 0, 0, 1, 1, 1], [0], [0]>} : vector<2x8x16xf32>, vector<2x8x16xf32>, vector<2x8x8xf32> -> vector<2x8x8xf32>
    "tpu.trace_stop"() : () -> ()
    %188 = vector.broadcast %57 : vector<2x1x8xf32> to vector<2x8x8xf32>
    %189 = arith.addf %187, %188 : vector<2x8x8xf32>
    %cst_65 = arith.constant dense<0xFF800000> : vector<2x8xf32>
    %190 = vector.multi_reduction <maximumf>, %189, %cst_65 [2] : vector<2x8x8xf32> to vector<2x8xf32>
    %191 = vector.shape_cast %190 : vector<2x8xf32> to vector<2x8x1xf32>
    %192 = vector.broadcast %191 : vector<2x8x1xf32> to vector<2x8x8xf32>
    %193 = arith.subf %189, %192 : vector<2x8x8xf32>
    %194 = math.exp %193 : vector<2x8x8xf32>
    %cst_66 = arith.constant dense<0.000000e+00> : vector<2x8xf32>
    %195 = vector.multi_reduction <add>, %194, %cst_66 [2] : vector<2x8x8xf32> to vector<2x8xf32>
    %196 = vector.shape_cast %195 : vector<2x8xf32> to vector<2x8x1xf32>
    %197 = tpu.reciprocal %196 {approx = true} : vector<2x8x1xf32> -> vector<2x8x1xf32>
    %198 = vector.broadcast %197 : vector<2x8x1xf32> to vector<2x8x8xf32>
    %199 = arith.mulf %194, %198 : vector<2x8x8xf32>
    "tpu.trace_start"() <{level = 10 : i32, message = "bqk,bkd->bqd"}> : () -> ()
    %cst_67 = arith.constant dense<0.000000e+00> : vector<2x8x16xf32>
    %200 = tpu.matmul %199, %186, %cst_67 {dimension_numbers = #tpu.dot_dimension_numbers<[2], [1], [1], [2], [0, 0, 0, 1, 1, 2], [0], [0]>} : vector<2x8x8xf32>, vector<2x8x16xf32>, vector<2x8x16xf32> -> vector<2x8x16xf32>
    "tpu.trace_stop"() : () -> ()
    %201 = vector.shape_cast %200 : vector<2x8x16xf32> to vector<16x16xf32>
    %202 = tpu.concatenate %75, %93, %111, %129, %147, %165, %183, %201 in 1 : vector<16x16xf32>, vector<16x16xf32>, vector<16x16xf32>, vector<16x16xf32>, vector<16x16xf32>, vector<16x16xf32>, vector<16x16xf32>, vector<16x16xf32> -> vector<16x128xf32>
    %c0_68 = arith.constant 0 : index
    %c0_69 = arith.constant 0 : index
    %203 = vector.load %arg13[%c0_68, %c0_69] : memref<128x128xf32, #tpu.memory_space<vmem>>, vector<128x128xf32>
    %cst_70 = arith.constant dense<0.000000e+00> : vector<16x128xf32>
    %204 = tpu.matmul %202, %203, %cst_70 {dimension_numbers = #tpu.dot_dimension_numbers<[1], [0], [0], [1], [0, 0, 1, 1], [], []>} : vector<16x128xf32>, vector<128x128xf32>, vector<16x128xf32> -> vector<16x128xf32>
    %c0_71 = arith.constant 0 : index
    %c0_72 = arith.constant 0 : index
    %205 = vector.load %arg14[%c0_71, %c0_72] : memref<1x128xf32, #tpu.memory_space<vmem>>, vector<1x128xf32>
    %206 = vector.broadcast %205 : vector<1x128xf32> to vector<16x128xf32>
    %207 = arith.addf %204, %206 : vector<16x128xf32>
    %c0_73 = arith.constant 0 : index
    %c0_74 = arith.constant 0 : index
    %208 = vector.load %arg15[%c0_73, %c0_74] : memref<16x128xf32, #tpu.memory_space<vmem>>, vector<16x128xf32>
    tpu.vector_store %arg15[%c0_73, %c0_74], %207 {strides = array<i32>} : memref<16x128xf32, #tpu.memory_space<vmem>>, vector<16x128xf32>,
    return
  }
}

</mosaic_0001>

<bundles_post_ra>
// kernel: tpu_custom_call.1
= control target key start
LH: loop header
LB: loop body
LE: loop exit
PB: predicated region body
PF: predicated region fallthrough
CT: control target
= control target key end

     0   :  { %20 = vsyncpa [#allocation3], 0  ;;  %s2644_s0 = inlined_call_operand.hbm [shape: f32[16,128], index: 0, kind: input, shape index: {}]   ;;  %s2645_s1 = inlined_call_operand.hbm [shape: f32[16,256], index: 1, kind: input, shape index: {}]   ;;  %s2646_s2 = inlined_call_operand.hbm [shape: f32[2,1,8], index: 2, kind: input, shape index: {}]   ;;  %s2647_s3 = inlined_call_operand.hbm [shape: f32[256,128], index: 3, kind: input, shape index: {}]   ;;  %s2648_s4 = inlined_call_operand.vmem [shape: f32[1,128], index: 4, kind: input, shape index: {}]   ;;  %s2649_s5 = inlined_call_operand.vmem [shape: f32[1,128], index: 5, kind: input, shape index: {}]   ;;  %s2650_s6 = inlined_call_operand.vmem [shape: f32[1,128], index: 6, kind: input, shape index: {}]   ;;  %s2651_s7 = inlined_call_operand.hbm [shape: f32[128,128], index: 7, kind: input, shape index: {}]   ;;  %s2652_s8 = inlined_call_operand.vmem [shape: f32[1,128], index: 8, kind: input, shape index: {}]   ;;  %s2653_s9 = inlined_call_operand.hbm [shape: f32[128,128], index: 9, kind: input, shape index: {}]   ;;  %s2654_s10 = inlined_call_operand.vmem [shape: f32[1,128], index: 10, kind: input, shape index: {}]   ;;  %s2655_s11 = inlined_call_operand.hbm [shape: f32[128,256], index: 11, kind: input, shape index: {}]   ;;  %s2656_s12 = inlined_call_operand.vmem [shape: f32[1,256], index: 12, kind: input, shape index: {}]   ;;  %s2657_s13 = inlined_call_operand.hbm [shape: f32[128,128], index: 13, kind: input, shape index: {}]   ;;  %s2658_s14 = inlined_call_operand.vmem [shape: f32[1,128], index: 14, kind: input, shape index: {}]   ;;  %s2659_s15 = inlined_call_operand.hbm [shape: f32[16,128], index: 15, kind: output, shape index: {}]  }
   0x1   :  { %21 = vsyncpa [#allocation6], 0 }
   0x2   :  { %22 = vsyncpa [#allocation9], 0 }
   0x3   :  { %23 = vsyncpa [#allocation12], 0 }
   0x4   :  { %24 = vsyncpa [#allocation15], 0  ;;  %s43_s20 = sshll.u32 %s2645_s1, 4  ;;  %s44_s20 = int_to_ptr.hbm [resolvable:$true] %s43_s20 }
   0x5   :  { %25 = vsyncpa [#allocation4], 0  ;;  %s2119_s21 = smov [#allocation5]   ;;  %s2120_s23 = smov 256  }
   0x6   :  { %s45_s22 = sshll.u32 %s2119_s21, 4  ;;  %s2121_s24 = smov 16   ;;  %s46_s22 = int_to_ptr.vmem [resolvable:$true] %s45_s22 }
   0x7   :  { %51 = dma.hbm_to_vmem [thread:$0]  %s44_s20, 512, %s46_s22, [#allocation6], %s2120_s23, %s2120_s23, %s2121_s24  }
   0x8   :  { %s69_s27 = sshll.u32 %s2647_s3, 4  ;;  %s2122_s28 = smov [#allocation8]   ;;  %s70_s27 = int_to_ptr.hbm [resolvable:$true] %s69_s27 }
   0x9   :  { %s71_s29 = sshll.u32 %s2122_s28, 4  ;;  %s103_s16 = sshll.u32 %s2653_s9, 4  ;;  %s72_s29 = int_to_ptr.vmem [resolvable:$true] %s71_s29  ;;  %s104_s16 = int_to_ptr.hbm [resolvable:$true] %s103_s16 }
   0xa   :  { %s2123_s17 = smov 128   ;;  %s2124_s18 = smov 8  }
   0xb   :  { %77 = dma.hbm_to_vmem [thread:$0]  %s70_s27, 4096, %s72_s29, [#allocation9], %s2123_s17, %s2123_s17, %s2124_s18  }
   0xc   :  { %s30_s21 = sshll.u32 %s2644_s0, 4  ;;  %s2125_s3 = smov [#allocation11]   ;;  %s31_s21 = int_to_ptr.hbm [resolvable:$true] %s30_s21 }
   0xd   :  { %s105_s22 = sshll.u32 %s2125_s3, 4  ;;  %s2126_s9 = smov [#allocation2]   ;;  %s106_s22 = int_to_ptr.vmem [resolvable:$true] %s105_s22 }
   0xe   :  { %111 = dma.hbm_to_vmem [thread:$0]  %s104_s16, 2048, %s106_s22, [#allocation12], %s2123_s17, %s2123_s17, %s2124_s18  }
   0xf   :  { %s32_s25 = sshll.u32 %s2126_s9, 4  ;;  %s56_s30 = sshll.u32 %s2646_s2, 4  ;;  %s33_s25 = int_to_ptr.vmem [resolvable:$true] %s32_s25  ;;  %s57_s30 = int_to_ptr.hbm [resolvable:$true] %s56_s30 }
  0x10   :  { %38 = dma.hbm_to_vmem [thread:$0]  %s31_s21, 256, %s33_s25, [#allocation3], %s2123_s17, %s2123_s17, %s2124_s18  }
  0x11   :  { %s2127_s0 = smov [#allocation7]   ;;  %s88_s19 = sshll.u32 %s2651_s7, 4  ;;  %s89_s19 = int_to_ptr.hbm [resolvable:$true] %s88_s19 }
  0x12   :  { %s58_s27 = sshll.u32 %s2127_s0, 4  ;;  %s2128_s16 = smov 1   ;;  %s59_s27 = int_to_ptr.vmem [resolvable:$true] %s58_s27 }
  0x13   :  { %64 = dma.hbm_to_vmem [thread:$0]  %s57_s30, 32, %s59_s27, [#allocation6], %s2121_s24, %s2121_s24, %s2128_s16  }
  0x14   :  { %s118_s3 = sshll.u32 %s2655_s11, 4  ;;  %s2129_s22 = smov [#allocation10]   ;;  %s119_s3 = int_to_ptr.hbm [resolvable:$true] %s118_s3 }
  0x15   :  { %s90_s9 = sshll.u32 %s2129_s22, 4  ;;  %s2130_s21 = smov [#allocation13]   ;;  %s91_s9 = int_to_ptr.vmem [resolvable:$true] %s90_s9 }
  0x16   :  { %96 = dma.hbm_to_vmem [thread:$0]  %s89_s19, 2048, %s91_s9, [#allocation9], %s2123_s17, %s2123_s17, %s2124_s18  }
  0x17   :  { %s120_s7 = sshll.u32 %s2130_s21, 4  ;;  %s133_s28 = sshll.u32 %s2657_s13, 4  ;;  %s121_s7 = int_to_ptr.vmem [resolvable:$true] %s120_s7  ;;  %s134_s28 = int_to_ptr.hbm [resolvable:$true] %s133_s28 }
  0x18   :  { %126 = dma.hbm_to_vmem [thread:$0]  %s119_s3, 4096, %s121_s7, [#allocation12], %s2120_s23, %s2120_s23, %s2121_s24  }
  0x19   :  { %s2131_s11 = smov [#allocation14]  }
  0x1a   :  { %s135_s30 = sshll.u32 %s2131_s11, 4  ;;  %s136_s30 = int_to_ptr.vmem [resolvable:$true] %s135_s30 }
  0x1b   :  { %141 = dma.hbm_to_vmem [thread:$0]  %s134_s28, 2048, %s136_s30, [#allocation15], %s2123_s17, %s2123_s17, %s2124_s18  }
  0x1c   :  { %2107 = dma.done.wait [#allocation3], 256  }
  0x1d   :  { %2108 = vsyncadd [#allocation3], 4294967040 }
  0x1e   :  { %2109 = dma.done.wait [#allocation6], 544  }
  0x1f   :  { %2110 = vsyncadd [#allocation6], 4294966752 }
  0x20   :  { %2111 = dma.done.wait [#allocation9], 6144  }
  0x21   :  { %2112 = vsyncadd [#allocation9], 4294961152 }
  0x22   :  { %2113 = dma.done.wait [#allocation12], 6144  }
  0x23   :  { %2114 = vsyncadd [#allocation12], 4294961152 }
  0x24   :  { %2115 = dma.done.wait [#allocation15], 2048  }
  0x25   :  { %2116 = vsyncadd [#allocation15], 4294965248  ;;  %v195_v0 = vld [vmem:[#allocation8 + $0x78] sm:$0xff]  ;;  %v194_v1 = vld [vmem:[#allocation8 + $0x70] sm:$0xff]  ;;  %v2132_v45 = vmov 128.0   ;;  %s2133_s16 = smov 112  }
  0x26   :  { %216 = vmatpush.msra.mxu1 %v195_v0  ;;  %v193_v2 = vld [vmem:[#allocation8 + $0x68] sm:$0xff]  ;;  %v192_v3 = vld [vmem:[#allocation8 + $0x60] sm:$0xff]  ;;  %v191_v4 = vld [vmem:[#allocation8 + $0x58] sm:$0xff]  ;;  %1821 = vrcp.f32 %v2132_v45  ;;  %vm505_vm7 = vcmask 130048   ;;  %s2136_s2 = smov 48   ;;  %s2137_s3 = smov 32  }
  0x27   :  { %v190_v5 = vld [vmem:[#allocation8 + $0x50] sm:$0xff]  ;;  %v189_v6 = vld [vmem:[#allocation8 + $0x48] sm:$0xff]  ;;  %v188_v7 = vld [vmem:[#allocation8 + $0x40] sm:$0xff]  ;;  %s2138_s22 = smov 64   ;;  %vm558_vm8 = vcmask 64512   ;;  %vm1597_vm9 = vcmask 261120  }
  0x28   :  { %217 = vmatpush.msra.mxu1 %v194_v1  ;;  %v187_v8 = vld [vmem:[#allocation8 + $0x38] sm:$0xff]  ;;  %v186_v9 = vld [vmem:[#allocation8 + $0x30] sm:$0xff]  ;;  %v185_v10 = vld [vmem:[#allocation8 + $0x28] sm:$0xff]  ;;  %vm1600_vm10 = vcmask 392192   ;;  %vm1603_vm11 = vcmask 523264   ;;  %vm1606_vm12 = vcmask 654336  }
  0x29   :  { %v184_v11 = vld [vmem:[#allocation8 + $0x20] sm:$0xff]  ;;  %v183_v12 = vld [vmem:[#allocation8 + $0x18] sm:$0xff]  ;;  %v182_v13 = vld [vmem:[#allocation8 + $0x10] sm:$0xff]  ;;  %vm1609_vm13 = vcmask 785408   ;;  %vm1612_vm14 = vcmask 916480   ;;  %s2139_s21 = smov [#allocation16]  }
  0x2a   :  { %218 = vmatpush.msra.mxu1 %v193_v2  ;;  %v181_v14 = vld [vmem:[#allocation8 + $0x8] sm:$0xff]  ;;  %v180_v15 = vld [vmem:[#allocation8] sm:$0xff]  ;;  %v211_v16 = vld [vmem:[#allocation8 + $0xf8] sm:$0xff]  ;;  %s1664_s7 = sshll.u32 %s2139_s21, 4  ;;  %s1666_s28 = sshll.u32 %s2659_s15, 4  ;;  %s1665_s7 = int_to_ptr.vmem [resolvable:$true] %s1664_s7  ;;  %s1667_s28 = int_to_ptr.hbm [resolvable:$true] %s1666_s28 }
  0x2b   :  { %v176_v17 = vld [vmem:[#allocation5] sm:$0xff]  ;;  %v210_v18 = vld [vmem:[#allocation8 + $0xf0] sm:$0xff]  ;;  %v209_v19 = vld [vmem:[#allocation8 + $0xe8] sm:$0xff] }
  0x2c   :  { %219 = vmatpush.msra.mxu1 %v192_v3  ;;  %v208_v20 = vld [vmem:[#allocation8 + $0xe0] sm:$0xff]  ;;  %v207_v21 = vld [vmem:[#allocation8 + $0xd8] sm:$0xff]  ;;  %v178_v22 = vld [vmem:[#allocation5 + $0x10] sm:$0xff]  ;;  %v1822_v46 = vpop.eup %1821 }
  0x2d   :  { %v206_v23 = vld [vmem:[#allocation8 + $0xd0] sm:$0xff]  ;;  %v205_v24 = vld [vmem:[#allocation8 + $0xc8] sm:$0xff]  ;;  %v204_v25 = vld [vmem:[#allocation8 + $0xc0] sm:$0xff]  ;;  %v267_v47 = vmul.f32 128.0, %v1822_v46  ;;  %vm271_vm0 = vweird.f32 %v1822_v46 }
  0x2e   :  { %220 = vmatpush.msra.mxu1 %v191_v4  ;;  %v203_v26 = vld [vmem:[#allocation8 + $0xb8] sm:$0xff]  ;;  %v202_v27 = vld [vmem:[#allocation8 + $0xb0] sm:$0xff]  ;;  %v201_v28 = vld [vmem:[#allocation8 + $0xa8] sm:$0xff] }
  0x2f   :  { %v200_v29 = vld [vmem:[#allocation8 + $0xa0] sm:$0xff]  ;;  %v199_v30 = vld [vmem:[#allocation8 + $0x98] sm:$0xff]  ;;  %v198_v31 = vld [vmem:[#allocation8 + $0x90] sm:$0xff]  ;;  %v268_v49 = vsub.f32 1.0, %v267_v47 }
  0x30   :  { %221 = vmatpush.msra.mxu1 %v190_v5  ;;  %v197_v32 = vld [vmem:[#allocation8 + $0x88] sm:$0xff]  ;;  %v196_v33 = vld [vmem:[#allocation8 + $0x80] sm:$0xff]  ;;  %v179_v35 = vld [vmem:[#allocation5 + $0x18] sm:$0xff] }
  0x31   :  { %v177_v34 = vld [vmem:[#allocation5 + $0x8] sm:$0xff]  ;;  %v1813_v38 = vld [vmem:[%s2648_s4] ss:$0 sm:$0xff]  ;;  %v338_v48 = vld [vmem:[#allocation10 + $0x78] sm:$0xff]  ;;  %v269_v50 = vmul.f32 %v1822_v46, %v268_v49 }
  0x32   :  { %222 = vmatpush.msra.mxu1 %v189_v6  ;;  %343 = vmatpush.msra.mxu2 %v338_v48  ;;  %v337_v61 = vld [vmem:[#allocation10 + $0x70] sm:$0xff]  ;;  %v336_v62 = vld [vmem:[#allocation10 + $0x68] sm:$0xff]  ;;  %v335_v63 = vld [vmem:[#allocation10 + $0x60] sm:$0xff] }
  0x33   :  { %v270_v51 = vadd.f32 %v1822_v46, %v269_v50  ;;  %v334_v0 = vld [vmem:[#allocation10 + $0x58] sm:$0xff]  ;;  %v333_v1 = vld [vmem:[#allocation10 + $0x50] sm:$0xff]  ;;  %v332_v2 = vld [vmem:[#allocation10 + $0x48] sm:$0xff] }
  0x34   :  { %223 = vmatpush.msra.mxu1 %v188_v7  ;;  %344 = vmatpush.msra.mxu2 %v337_v61  ;;  %v331_v3 = vld [vmem:[#allocation10 + $0x40] sm:$0xff]  ;;  %v330_v4 = vld [vmem:[#allocation10 + $0x38] sm:$0xff]  ;;  %v329_v5 = vld [vmem:[#allocation10 + $0x30] sm:$0xff] }
  0x35   :  { %v272_v52 = vsel %vm271_vm0, %v1822_v46, %v270_v51  ;;  %v328_v6 = vld [vmem:[#allocation10 + $0x28] sm:$0xff]  ;;  %v327_v7 = vld [vmem:[#allocation10 + $0x20] sm:$0xff]  ;;  %v375_v47 = vld [vmem:[#allocation11 + $0x38] sm:$0xff] }
  0x36   :  { %224 = vmatpush.msra.mxu1 %v187_v8  ;;  %345 = vmatpush.msra.mxu2 %v336_v62  ;;  %v326_v8 = vld [vmem:[#allocation10 + $0x18] sm:$0xff]  ;;  %v1814_v45 = vld [vmem:[%s2649_s5] ss:$0 sm:$0xff]  ;;  %v429_v48 = vld [vmem:[#allocation13 + $0x90] sm:$0xff] }
  0x37   :  { %v432_v46 = vld [vmem:[#allocation13 + $0xa8] sm:$0xff]  ;;  %v430_v51 = vld [vmem:[#allocation13 + $0x98] sm:$0xff]  ;;  %v425_v62 = vld [vmem:[#allocation13 + $0x70] sm:$0xff] }
  0x38   :  { %225 = vmatpush.msra.mxu1 %v186_v9  ;;  %346 = vmatpush.msra.mxu2 %v335_v63  ;;  %v325_v9 = vld [vmem:[#allocation10 + $0x10] sm:$0xff]  ;;  %v373_v61 = vld [vmem:[#allocation11 + $0x28] sm:$0xff] }
  0x3a   :  { %226 = vmatpush.msra.mxu1 %v185_v10  ;;  %347 = vmatpush.msra.mxu2 %v334_v0  ;;  %v324_v10 = vld [vmem:[#allocation10 + $0x8] sm:$0xff] }
  0x3c   :  { %227 = vmatpush.msra.mxu1 %v184_v11  ;;  %348 = vmatpush.msra.mxu2 %v333_v1  ;;  %v323_v11 = vld [vmem:[#allocation10] sm:$0xff] }
  0x3d   :  { %v372_v1 = vld [vmem:[#allocation11 + $0x20] sm:$0xff] }
  0x3e   :  { %228 = vmatpush.msra.mxu1 %v183_v12  ;;  %349 = vmatpush.msra.mxu2 %v332_v2  ;;  %v423_v2 = vld [vmem:[#allocation13 + $0x60] sm:$0xff] }
  0x40   :  { %229 = vmatpush.msra.mxu1 %v182_v13  ;;  %350 = vmatpush.msra.mxu2 %v331_v3 }
  0x42   :  { %230 = vmatpush.msra.mxu1 %v181_v14  ;;  %351 = vmatpush.msra.mxu2 %v330_v4  ;;  %v424_v4 = vld [vmem:[#allocation13 + $0x68] sm:$0xff] }
  0x44   :  { %231 = vmatpush.msra.mxu1 %v180_v15  ;;  %352 = vmatpush.msra.mxu2 %v329_v5  ;;  %v383_v15 = vld [vmem:[#allocation11 + $0x78] sm:$0xff] }
  0x45   :  { %232 = vmatmul.f32.vlgmr.msra.gmra.mxu1 %v176_v17  ;;  %388 = vmatpush.msra.mxu3 %v383_v15  ;;  %v369_v15 = vld [vmem:[#allocation11 + $0x8] sm:$0xff] }
  0x46   :  { %239 = vmatpush.msrb.mxu1 %v211_v16  ;;  %353 = vmatpush.msra.mxu2 %v328_v6  ;;  %v382_v16 = vld [vmem:[#allocation11 + $0x70] sm:$0xff]  ;;  %v371_v6 = vld [vmem:[#allocation11 + $0x18] sm:$0xff] }
  0x47   :  { %389 = vmatpush.msra.mxu3 %v382_v16  ;;  %v417_v16 = vld [vmem:[#allocation13 + $0x30] sm:$0xff] }
  0x48   :  { %240 = vmatpush.msrb.mxu1 %v210_v18  ;;  %354 = vmatpush.msra.mxu2 %v327_v7  ;;  %v421_v7 = vld [vmem:[#allocation13 + $0x50] sm:$0xff] }
  0x4a   :  { %241 = vmatpush.msrb.mxu1 %v209_v19  ;;  %355 = vmatpush.msra.mxu2 %v326_v8  ;;  %v381_v19 = vld [vmem:[#allocation11 + $0x68] sm:$0xff] }
  0x4b   :  { %390 = vmatpush.msra.mxu3 %v381_v19  ;;  %v368_v19 = vld [vmem:[#allocation11] sm:$0xff] }
  0x4c   :  { %242 = vmatpush.msrb.mxu1 %v208_v20  ;;  %356 = vmatpush.msra.mxu2 %v325_v9  ;;  %v422_v9 = vld [vmem:[#allocation13 + $0x58] sm:$0xff] }
  0x4d   :  { %235 = vmatmul.f32.gmra.mxu1 %v178_v22  ;;  %v380_v22 = vld [vmem:[#allocation11 + $0x60] sm:$0xff] }
  0x4e   :  { %243 = vmatpush.msrb.mxu1 %v207_v21  ;;  %357 = vmatpush.msra.mxu2 %v324_v10 }
  0x4f   :  { %391 = vmatpush.msra.mxu3 %v380_v22  ;;  %v416_v22 = vld [vmem:[#allocation13 + $0x28] sm:$0xff] }
  0x50   :  { %244 = vmatpush.msrb.mxu1 %v206_v23  ;;  %358 = vmatpush.msra.mxu2 %v323_v11  ;;  %v441_v23 = vld [vmem:[#allocation13 + $0xf0] sm:$0xff] }
  0x51   :  { %449 = vmatpush.msra.mxu0 %v441_v23  ;;  %v370_v11 = vld [vmem:[#allocation11 + $0x10] sm:$0xff] }
  0x52   :  { %245 = vmatpush.msrb.mxu1 %v205_v24  ;;  %v442_v24 = vld [vmem:[#allocation13 + $0xf8] sm:$0xff] }
  0x53   :  { %1731 = vmatpush.msrb.mxu2 %v442_v24  ;;  %v367_v23 = vld [vmem:[#allocation2 + $0x8] sm:$0xff] }
  0x54   :  { %246 = vmatpush.msrb.mxu1 %v204_v25 }
  0x56   :  { %247 = vmatpush.msrb.mxu1 %v203_v26  ;;  %v439_v26 = vld [vmem:[#allocation13 + $0xe0] sm:$0xff] }
  0x57   :  { %450 = vmatpush.msra.mxu0 %v439_v26  ;;  %v411_v26 = vld [vmem:[#allocation13] sm:$0xff] }
  0x58   :  { %248 = vmatpush.msrb.mxu1 %v202_v27  ;;  %v440_v27 = vld [vmem:[#allocation13 + $0xe8] sm:$0xff] }
  0x59   :  { %1732 = vmatpush.msrb.mxu2 %v440_v27 }
  0x5a   :  { %249 = vmatpush.msrb.mxu1 %v201_v28  ;;  %v379_v28 = vld [vmem:[#allocation11 + $0x58] sm:$0xff] }
  0x5b   :  { %392 = vmatpush.msra.mxu3 %v379_v28  ;;  %v1816_v28 = vld [vmem:[%s2652_s8] ss:$0 sm:$0xff] }
  0x5c   :  { %250 = vmatpush.msrb.mxu1 %v200_v29  ;;  %v437_v29 = vld [vmem:[#allocation13 + $0xd0] sm:$0xff] }
  0x5d   :  { %451 = vmatpush.msra.mxu0 %v437_v29 }
  0x5e   :  { %251 = vmatpush.msrb.mxu1 %v199_v30 }
  0x60   :  { %252 = vmatpush.msrb.mxu1 %v198_v31  ;;  %v438_v31 = vld [vmem:[#allocation13 + $0xd8] sm:$0xff] }
  0x61   :  { %1733 = vmatpush.msrb.mxu2 %v438_v31 }
  0x62   :  { %253 = vmatpush.msrb.mxu1 %v197_v32  ;;  %v378_v32 = vld [vmem:[#allocation11 + $0x50] sm:$0xff] }
  0x63   :  { %393 = vmatpush.msra.mxu3 %v378_v32 }
  0x64   :  { %254 = vmatpush.msrb.mxu1 %v196_v33  ;;  %v435_v33 = vld [vmem:[#allocation13 + $0xc0] sm:$0xff] }
  0x65   :  { %255 = vmatmul.f32.vlgmr.msrb.gmra.mxu1 %v177_v34  ;;  %452 = vmatpush.msra.mxu0 %v435_v33 }
  0x66   :  { %472 = vmatpush.msra.mxu1 %v442_v24  ;;  %v413_v24 = vld [vmem:[#allocation13 + $0x10] sm:$0xff] }
  0x68   :  { %473 = vmatpush.msra.mxu1 %v440_v27  ;;  %v412_v27 = vld [vmem:[#allocation13 + $0x8] sm:$0xff] }
  0x6a   :  { %474 = vmatpush.msra.mxu1 %v438_v31 }
  0x6d   :  { %258 = vmatmul.f32.gmra.mxu1 %v179_v35  ;;  %v436_v35 = vld [vmem:[#allocation13 + $0xc8] sm:$0xff] }
  0x6e   :  { %475 = vmatpush.msra.mxu1 %v436_v35  ;;  %1734 = vmatpush.msrb.mxu2 %v436_v35 }
  0xc2   :  { %v233_v36 = vpop.f32.mrf.mxu1 }
  0xc3   :  { %v234_v39 = vadd.f32 %v1813_v38, %v233_v36  ;;  %v377_v36 = vld [vmem:[#allocation11 + $0x48] sm:$0xff] }
  0xc4   :  { %394 = vmatpush.msra.mxu3 %v377_v36 }
  0xca   :  { %v236_v37 = vpop.f32.mrf.mxu1 }
  0xcb   :  { %v237_v42 = vadd.f32 %v1813_v38, %v236_v37  ;;  %v433_v37 = vld [vmem:[#allocation13 + $0xb0] sm:$0xff] }
  0xcc   :  { %453 = vmatpush.msra.mxu0 %v433_v37 }
  0xe2   :  { %v256_v40 = vpop.f32.mrf.mxu1 }
  0xe3   :  { %v257_v41 = vadd.f32 %v256_v40, %v234_v39  ;;  %v434_v39 = vld [vmem:[#allocation13 + $0xb8] sm:$0xff] }
  0xe4   :  { %476 = vmatpush.msra.mxu1 %v434_v39  ;;  %1735 = vmatpush.msrb.mxu2 %v434_v39 }
  0xe5   :  { %262 = vadd.xlane.f32.xlu0 %v257_v41 }
  0xe6   :  { %477 = vmatpush.msra.mxu1 %v432_v46  ;;  %1736 = vmatpush.msrb.mxu2 %v432_v46 }
  0xe8   :  { %478 = vmatpush.msra.mxu1 %v430_v51  ;;  %1737 = vmatpush.msrb.mxu2 %v430_v51 }
  0xea   :  { %v259_v43 = vpop.f32.mrf.mxu1 }
  0xeb   :  { %v260_v44 = vadd.f32 %v259_v43, %v237_v42  ;;  %v431_v42 = vld [vmem:[#allocation13 + $0xa0] sm:$0xff] }
  0xec   :  { %454 = vmatpush.msra.mxu0 %v431_v42 }
  0xed   :  { %264 = vadd.xlane.f32.xlu0 %v260_v44 }
  0xee   :  { %455 = vmatpush.msra.mxu0 %v429_v48 }
 0x158   :  { %v263_v53 = vpop.xlane.xlu0 %262 }
 0x159   :  { %v273_v54 = vmul.f32 %v272_v52, %v263_v53  ;;  %v1815_v53 = vld [vmem:[%s2650_s6] ss:$0 sm:$0xff] }
 0x15b   :  { %v2270_v55 = vsub.f32 %v257_v41, %v273_v54  ;;  %v376_v41 = vld [vmem:[#allocation11 + $0x40] sm:$0xff]  ;;  %v374_v54 = vld [vmem:[#allocation11 + $0x30] sm:$0xff] }
 0x15c   :  { %395 = vmatpush.msra.mxu3 %v376_v41 }
 0x15d   :  { %v277_v56 = vmul.f32 %v2270_v55, %v2270_v55 }
 0x15e   :  { %396 = vmatpush.msra.mxu3 %v375_v47 }
 0x15f   :  { %279 = vadd.xlane.f32.xlu1 %v277_v56  ;;  %v427_v56 = vld [vmem:[#allocation13 + $0x80] sm:$0xff] }
 0x160   :  { %v265_v57 = vpop.xlane.xlu0 %264  ;;  %397 = vmatpush.msra.mxu3 %v374_v54  ;;  %456 = vmatpush.msra.mxu0 %v427_v56 }
 0x161   :  { %v274_v58 = vmul.f32 %v272_v52, %v265_v57 }
 0x162   :  { %398 = vmatpush.msra.mxu3 %v373_v61  ;;  %457 = vmatpush.msra.mxu0 %v425_v62 }
 0x163   :  { %v2274_v59 = vsub.f32 %v260_v44, %v274_v58  ;;  %v428_v58 = vld [vmem:[#allocation13 + $0x88] sm:$0xff] }
 0x164   :  { %479 = vmatpush.msra.mxu1 %v428_v58  ;;  %1738 = vmatpush.msrb.mxu2 %v428_v58  ;;  %v2378_v58 = vld [vmem:[#allocation7 + $0x1] ss:$0 sm:$0xff] }
 0x165   :  { %v278_v60 = vmul.f32 %v2274_v59, %v2274_v59  ;;  %399 = vmatpush.msra.mxu3 %v372_v1  ;;  %458 = vmatpush.msra.mxu0 %v423_v2 }
 0x167   :  { %281 = vadd.xlane.f32.xlu1 %v278_v60  ;;  %400 = vmatpush.msra.mxu3 %v371_v6 }
 0x168   :  { %459 = vmatpush.msra.mxu0 %v421_v7 }
 0x169   :  { %401 = vmatpush.msra.mxu3 %v370_v11 }
 0x16b   :  { %402 = vmatpush.msra.mxu3 %v369_v15 }
 0x16d   :  { %403 = vmatpush.msra.mxu3 %v368_v19 }
 0x1d2   :  { %v280_v12 = vpop.xlane.xlu1 %279 }
 0x1d3   :  { %v283_v13 = vmul.f32 %v280_v12, %v272_v52  ;;  %v419_v12 = vld [vmem:[#allocation13 + $0x40] sm:$0xff] }
 0x1d4   :  { %460 = vmatpush.msra.mxu0 %v419_v12 }
 0x1d5   :  { %v285_v14 = vadd.f32 1e-05, %v283_v13  ;;  %v420_v13 = vld [vmem:[#allocation13 + $0x48] sm:$0xff] }
 0x1d6   :  { %461 = vmatpush.msra.mxu0 %v417_v16 }
 0x1d7   :  { %1823 = vrsqrt.f32 %v285_v14  ;;  %vm293_vm2 = vweird.f32 %v285_v14 }
 0x1da   :  { %v282_v17 = vpop.xlane.xlu1 %281 }
 0x1db   :  { %v284_v18 = vmul.f32 %v282_v17, %v272_v52  ;;  %v418_v17 = vld [vmem:[#allocation13 + $0x38] sm:$0xff] }
 0x1dd   :  { %v1824_v20 = vpop.eup %1823  ;;  %v2278_v21 = vadd.f32 1e-05, %v284_v18 }
 0x1de   :  { %v288_v25 = vmul.f32 %v1824_v20, %v285_v14  ;;  %vm294_vm1 = vweird.f32 %v1824_v20 }
 0x1df   :  { %1825 = vrsqrt.f32 %v2278_v21  ;;  %vm295_vm3 = vmor %vm293_vm2, %vm294_vm1  ;;  %vm303_vm5 = vweird.f32 %v2278_v21 }
 0x1e0   :  { %v289_v30 = vmul.f32 %v1824_v20, %v288_v25  ;;  %v414_v25 = vld [vmem:[#allocation13 + $0x18] sm:$0xff] }
 0x1e2   :  { %v290_v34 = vmul.f32 0.5, %v289_v30 }
 0x1e4   :  { %v291_v38 = vsub.f32 1.5, %v290_v34  ;;  %v1817_v34 = vld [vmem:[%s2654_s10] ss:$0 sm:$0xff]  ;;  %s2134_s10 = smov 96  }
 0x1e5   :  { %v2281_v40 = vpop.eup %1825 }
 0x1e6   :  { %v292_v43 = vmul.f32 %v1824_v20, %v291_v38  ;;  %v298_v44 = vmul.f32 %v2281_v40, %v2278_v21  ;;  %vm304_vm4 = vweird.f32 %v2281_v40 }
 0x1e7   :  { %vm305_vm6 = vmor %vm303_vm5, %vm304_vm4 }
 0x1e8   :  { %v299_v49 = vmul.f32 %v2281_v40, %v298_v44  ;;  %v296_v50 = vsel %vm295_vm3, %v1824_v20, %v292_v43  ;;  %v415_v20 = vld [vmem:[#allocation13 + $0x20] sm:$0xff] }
 0x1e9   :  { %v307_v52 = vmul.f32 %v296_v50, %v2270_v55  ;;  %v426_v55 = vld [vmem:[#allocation13 + $0x78] sm:$0xff]  ;;  %462 = vmatpush.msra.mxu0 %v415_v20 }
 0x1ea   :  { %v300_v57 = vmul.f32 0.5, %v299_v49  ;;  %480 = vmatpush.msra.mxu1 %v426_v55  ;;  %1739 = vmatpush.msrb.mxu2 %v426_v55 }
 0x1eb   :  { %v313_v60 = vmul.f32 %v1814_v45, %v307_v52  ;;  %463 = vmatpush.msra.mxu0 %v413_v24 }
 0x1ec   :  { %v301_v63 = vsub.f32 1.5, %v300_v57  ;;  %481 = vmatpush.msra.mxu1 %v424_v4  ;;  %1740 = vmatpush.msrb.mxu2 %v424_v4 }
 0x1ed   :  { %v319_v0 = vadd.f32 %v1815_v53, %v313_v60  ;;  %464 = vmatpush.msra.mxu0 %v411_v26 }
 0x1ee   :  { %v302_v3 = vmul.f32 %v2281_v40, %v301_v63  ;;  %482 = vmatpush.msra.mxu1 %v422_v9  ;;  %1741 = vmatpush.msrb.mxu2 %v422_v9 }
 0x1ef   :  { %v321_v5 = vmax.f32 %v319_v0, 0.0 }
 0x1f0   :  { %v306_v8 = vsel %vm305_vm6, %v2281_v40, %v302_v3  ;;  %483 = vmatpush.msra.mxu1 %v420_v13  ;;  %1742 = vmatpush.msrb.mxu2 %v420_v13  ;;  %v443_v40 = vld [vmem:[%s2656_s12] sm:$0x3]  ;;  %s2135_s12 = smov 80  }
 0x1f1   :  { %359 = vmatmul.f32.vlgmr.msra.gmra.mxu2 %v321_v5  ;;  %v308_v10 = vmul.f32 %v306_v8, %v2274_v59  ;;  %v366_v59 = vld [vmem:[#allocation2] sm:$0xff]  ;;  %v445_v41 = vperm.slane %v443_v40, 0  ;;  %v446_v42 = vperm.slane %v443_v40, 1  ;;  %v2386_v8 = vld [vmem:[#allocation7] ss:$0 sm:$0xff] }
 0x1f2   :  { %484 = vmatpush.msra.mxu1 %v418_v17  ;;  %404 = vmatmul.f32.vlgmr.msra.gmra.mxu3 %v366_v59 }
 0x1f3   :  { %v314_v14 = vmul.f32 %v1814_v45, %v308_v10  ;;  %1743 = vmatpush.msrb.mxu2 %v418_v17 }
 0x1f4   :  { %485 = vmatpush.msra.mxu1 %v416_v22 }
 0x1f5   :  { %v320_v18 = vadd.f32 %v1815_v53, %v314_v14  ;;  %1744 = vmatpush.msrb.mxu2 %v416_v22 }
 0x1f6   :  { %486 = vmatpush.msra.mxu1 %v414_v25 }
 0x1f7   :  { %v322_v21 = vmax.f32 %v320_v18, 0.0  ;;  %1745 = vmatpush.msrb.mxu2 %v414_v25 }
 0x1f8   :  { %487 = vmatpush.msra.mxu1 %v412_v27 }
 0x1f9   :  { %362 = vmatmul.f32.gmra.mxu2 %v322_v21 }
 0x1fa   :  { %407 = vmatmul.f32.gmra.mxu3 %v367_v23  ;;  %1746 = vmatpush.msrb.mxu2 %v412_v27 }
 0x274   :  { %v360_v29 = vpop.f32.mrf.mxu2 }
 0x275   :  { %v361_v30 = vadd.f32 %v1816_v28, %v360_v29  ;;  %v405_v32 = vpop.f32.mrf.mxu3 }
 0x276   :  { %v406_v38 = vadd.f32 %v1817_v34, %v405_v32 }
 0x277   :  { %465 = vmatmul.f32.vlgmr.msra.gmra.mxu0 %v361_v30  ;;  %488 = vmatmul.f32.vlgmr.msra.gmra.mxu1 %v361_v30 }
 0x278   :  { %v2309_v39 = vmul.f32 0.25, %v406_v38 }
 0x27c   :  { %v363_v31 = vpop.f32.mrf.mxu2 }
 0x27d   :  { %v364_v33 = vadd.f32 %v1816_v28, %v363_v31  ;;  %v408_v35 = vpop.f32.mrf.mxu3 }
 0x27e   :  { %v409_v36 = vadd.f32 %v1817_v34, %v408_v35 }
 0x27f   :  { %468 = vmatmul.f32.gmra.mxu0 %v364_v33  ;;  %491 = vmatmul.f32.vlgmr.msrb.gmra.mxu2 %v364_v33 }
 0x280   :  { %v2305_v37 = vmul.f32 0.25, %v409_v36 }
 0x282   :  { %655 = vrot.lane.b32.xlu1 %v2305_v37, %s2133_s16 }
 0x28a   :  { %627 = vrot.lane.b32.xlu1 %v2309_v39, %s2133_s16 }
 0x2f4   :  { %v466_v43 = vpop.f32.mrf.mxu0  ;;  %v489_v44 = vpop.f32.mrf.mxu1 }
 0x2f5   :  { %v2316_v45 = vadd.f32 %v466_v43, %v445_v41  ;;  %v2318_v46 = vadd.f32 %v489_v44, %v446_v42  ;;  %v656_v51 = vpop.permute.xlu1 %655 }
 0x2f7   :  { %1683 = vmatpush.xpose.msk.msrb.mxu0 %vm505_vm7, %v2316_v45  ;;  %599 = vmatpush.msra.mxu2 %v2318_v46 }
 0x2fa   :  { %1684 = vmatmul.msk.f32.vlgmr.msrb.gmra.mxu0 %vm505_vm7, %v2309_v39 }
 0x2fc   :  { %v469_v47 = vpop.f32.mrf.mxu0 }
 0x2fd   :  { %v2325_v48 = vadd.f32 %v469_v47, %v445_v41  ;;  %v2375_v53 = vpop.permute.xlu1 %627 }
 0x2ff   :  { %789 = vrot.lane.b32.xlu1 %v2325_v48, %s2134_s10  ;;  %657 = vrot.lane.b32.xlu0 %v2325_v48, %s2133_s16 }
 0x300   :  { %1685 = vmatpush.xpose.msk.msrb.mxu3 %vm505_vm7, %v2325_v48 }
 0x302   :  { %v492_v49 = vpop.f32.mrf.mxu2 }
 0x303   :  { %v2333_v50 = vadd.f32 %v492_v49, %v446_v42  ;;  %1686 = vmatmul.msk.f32.vlgmr.msrb.gmra.mxu3 %vm505_vm7, %v2305_v37 }
 0x305   :  { %622 = vmatpush.msra.mxu3 %v2333_v50 }
 0x307   :  { %787 = vrot.lane.b32.xlu1 %v2305_v37, %s2134_s10  ;;  %629 = vrot.lane.b32.xlu0 %v2316_v45, %s2133_s16 }
 0x30f   :  { %889 = vrot.lane.b32.xlu1 %v2309_v39, %s2135_s12  ;;  %733 = vrot.lane.b32.xlu0 %v2333_v50, %s2133_s16 }
 0x317   :  { %917 = vrot.lane.b32.xlu1 %v2305_v37, %s2135_s12  ;;  %759 = vrot.lane.b32.xlu0 %v2309_v39, %s2134_s10 }
 0x31f   :  { %1151 = vrot.lane.b32.xlu1 %v2316_v45, %s2136_s2  ;;  %891 = vrot.lane.b32.xlu0 %v2316_v45, %s2135_s12 }
 0x327   :  { %1179 = vrot.lane.b32.xlu1 %v2325_v48, %s2136_s2  ;;  %919 = vrot.lane.b32.xlu0 %v2325_v48, %s2135_s12 }
 0x32f   :  { %1279 = vrot.lane.b32.xlu1 %v2309_v39, %s2137_s3  ;;  %1019 = vrot.lane.b32.xlu0 %v2309_v39, %s2138_s22 }
 0x337   :  { %1307 = vrot.lane.b32.xlu1 %v2305_v37, %s2137_s3  ;;  %1047 = vrot.lane.b32.xlu0 %v2305_v37, %s2138_s22 }
 0x33f   :  { %1437 = vrot.lane.b32.xlu1 %v2305_v37, %s2121_s24  ;;  %1281 = vrot.lane.b32.xlu0 %v2316_v45, %s2137_s3 }
 0x347   :  { %1309 = vrot.lane.b32.xlu0 %v2325_v48, %s2137_s3 }
 0x34f   :  { %1409 = vrot.lane.b32.xlu0 %v2309_v39, %s2121_s24 }
 0x371   :  { %v658_v52 = vpop.permute.xlu0 %657  ;;  %v790_v56 = vpop.permute.xlu1 %789 }
 0x372   :  { %1691 = vmatpush.xpose.msk.msrb.mxu3 %vm505_vm7, %v658_v52 }
 0x377   :  { %v529_v10 = vpop.f32.mrf.mxu0 }
 0x378   :  { %v530_v11 = vadd.f32 %v2386_v8, %v529_v10 }
 0x379   :  { %v630_v54 = vpop.permute.xlu0 %629  ;;  %v2381_v62 = vpop.permute.xlu1 %787 }
 0x37a   :  { %1689 = vmatpush.xpose.msk.msrb.mxu2 %vm505_vm7, %v630_v54  ;;  %v559_v12 = vsel %vm558_vm8, %v530_v11, -inf }
 0x381   :  { %v734_v57 = vpop.permute.xlu0 %733  ;;  %v890_v1 = vpop.permute.xlu1 %889 }
 0x386   :  { %v555_v60 = vpop.f32.mrf.mxu3 }
 0x387   :  { %v556_v61 = vadd.f32 %v2378_v58, %v555_v60 }
 0x389   :  { %v760_v63 = vpop.permute.xlu0 %759  ;;  %v562_v55 = vsel %vm558_vm8, %v556_v61, -inf  ;;  %v918_v3 = vpop.permute.xlu1 %917 }
 0x38a   :  { %563 = vmax.xlane.f32.xlu2 %v562_v55 }
 0x391   :  { %v892_v0 = vpop.permute.xlu0 %891  ;;  %v1152_v31 = vpop.permute.xlu1 %1151 }
 0x399   :  { %v920_v2 = vpop.permute.xlu0 %919  ;;  %v1180_v40 = vpop.permute.xlu1 %1179 }
 0x39a   :  { %1703 = vmatpush.xpose.msk.msrb.mxu1 %vm505_vm7, %v920_v2 }
 0x39d   :  { %1704 = vmatmul.msk.f32.vlgmr.msrb.gmra.mxu1 %vm505_vm7, %v918_v3 }
 0x3a1   :  { %v1020_v23 = vpop.permute.xlu0 %1019 }
 0x3a9   :  { %v1048_v30 = vpop.permute.xlu0 %1047 }
 0x3b1   :  { %v1282_v32 = vpop.permute.xlu0 %1281 }
 0x3b9   :  { %v1310_v43 = vpop.permute.xlu0 %1309 }
 0x3c1   :  { %v1410_v10 = vpop.permute.xlu0 %1409 }
 0x3fd   :  { %v564_v4 = vpop.xlane.xlu2 %563 }
 0x3fe   :  { %v566_v5 = vsub.f32 %v556_v61, %v564_v4 }
 0x400   :  { %v569_v6 = vmul.f32 1.442695, %v566_v5  ;;  %v1280_v5 = vpop.permute.xlu1 %1279 }
 0x402   :  { %1827 = vpow2.f32 %v569_v6 }
 0x408   :  { %v1828_v7 = vpop.eup %1827 }
 0x409   :  { %v574_v9 = vsel %vm558_vm8, %v1828_v7, 0.0 }
 0x40a   :  { %575 = vadd.xlane.f32.xlu2 %v574_v9 }
 0x412   :  { %560 = vmax.xlane.f32.xlu2 %v559_v12 }
 0x41a   :  { %v942_v55 = vpop.f32.mrf.mxu1 }
 0x47d   :  { %v576_v13 = vpop.xlane.xlu2 %575 }
 0x47e   :  { %1829 = vrcp.f32 %v576_v13 }
 0x484   :  { %v1830_v14 = vpop.eup %1829 }
 0x485   :  { %v580_v15 = vmul.f32 %v1830_v14, %v1828_v7  ;;  %v561_v16 = vpop.xlane.xlu2 %560  ;;  %v1308_v7 = vpop.permute.xlu1 %1307 }
 0x486   :  { %v565_v17 = vsub.f32 %v530_v11, %v561_v16 }
 0x487   :  { %1688 = vmatmul.msk.f32.vlgmr.msra.gmra.mxu3 %vm558_vm8, %v580_v15 }
 0x488   :  { %v567_v18 = vmul.f32 1.442695, %v565_v17  ;;  %754 = vmatpush.msra.mxu3 %v734_v57 }
 0x48a   :  { %1831 = vpow2.f32 %v567_v18 }
 0x48d   :  { %v1438_v12 = vpop.permute.xlu1 %1437 }
 0x48f   :  { %1692 = vmatmul.msk.f32.vlgmr.msrb.gmra.mxu3 %vm505_vm7, %v656_v51 }
 0x490   :  { %v1832_v19 = vpop.eup %1831  ;;  %1697 = vmatpush.xpose.msk.msrb.mxu3 %vm505_vm7, %v790_v56 }
 0x491   :  { %v571_v20 = vsel %vm558_vm8, %v1832_v19, 0.0 }
 0x492   :  { %572 = vadd.xlane.f32.xlu2 %v571_v20 }
 0x4aa   :  { %761 = vrot.lane.b32.xlu2 %v2316_v45, %s2134_s10 }
 0x4b2   :  { %1021 = vrot.lane.b32.xlu2 %v2316_v45, %s2138_s22 }
 0x505   :  { %v573_v59 = vpop.xlane.xlu2 %572 }
 0x506   :  { %1833 = vrcp.f32 %v573_v59 }
 0x50a   :  { %v2399_v21 = vpop.f32.mrf.mxu3 }
 0x50c   :  { %v1834_v22 = vpop.eup %1833 }
 0x50d   :  { %v579_v24 = vmul.f32 %v1834_v22, %v1832_v19  ;;  %v762_v25 = vpop.permute.xlu2 %761 }
 0x50e   :  { %1695 = vmatpush.xpose.msk.msra.mxu0 %vm505_vm7, %v762_v25 }
 0x50f   :  { %1687 = vmatmul.msk.f32.vlgmr.msra.gmra.mxu2 %vm558_vm8, %v579_v24 }
 0x511   :  { %1696 = vmatmul.msk.f32.vlgmr.msra.gmra.mxu0 %vm505_vm7, %v760_v63 }
 0x512   :  { %1701 = vmatpush.xpose.msk.msrb.mxu0 %vm505_vm7, %v892_v0  ;;  %v680_v26 = vpop.f32.mrf.mxu3  ;;  %v2446_v0 = vadd.f32 %v2378_v58, %v942_v55  ;;  %v2523_v55 = vpack.i.bf16 %v2333_v50, %v2318_v46 }
 0x513   :  { %v681_v27 = vadd.f32 %v2378_v58, %v680_v26 }
 0x515   :  { %v1022_v28 = vpop.permute.xlu2 %1021  ;;  %v686_v29 = vsel %vm558_vm8, %v681_v27, -inf }
 0x516   :  { %1707 = vmatpush.xpose.msk.msra.mxu0 %vm505_vm7, %v1022_v28  ;;  %687 = vmax.xlane.f32.xlu2 %v686_v29 }
 0x517   :  { %1690 = vmatmul.msk.f32.vlgmr.msrb.gmra.mxu2 %vm505_vm7, %v2375_v53 }
 0x519   :  { %1702 = vmatmul.msk.f32.vlgmr.msrb.gmra.mxu0 %vm505_vm7, %v890_v1 }
 0x51a   :  { %1713 = vmatpush.xpose.msk.msrb.mxu0 %vm505_vm7, %v1152_v31 }
 0x521   :  { %1708 = vmatmul.msk.f32.vlgmr.msra.gmra.mxu0 %vm505_vm7, %v1020_v23 }
 0x522   :  { %1719 = vmatpush.xpose.msk.msra.mxu0 %vm505_vm7, %v1282_v32 }
 0x52e   :  { %1049 = vrot.lane.b32.xlu2 %v2325_v48, %s2138_s22 }
 0x589   :  { %v688_v33 = vpop.xlane.xlu2 %687 }
 0x58a   :  { %v690_v34 = vsub.f32 %v681_v27, %v688_v33 }
 0x58c   :  { %v693_v35 = vmul.f32 1.442695, %v690_v34 }
 0x58e   :  { %1835 = vpow2.f32 %v693_v35  ;;  %v784_v36 = vpop.f32.mrf.mxu0 }
 0x58f   :  { %v785_v61 = vadd.f32 %v2386_v8, %v784_v36 }
 0x591   :  { %v1050_v38 = vpop.permute.xlu2 %1049  ;;  %v815_v63 = vsel %vm558_vm8, %v785_v61, -inf }
 0x592   :  { %v2416_v41 = vpop.f32.mrf.mxu2  ;;  %1709 = vmatpush.xpose.msk.msra.mxu1 %vm505_vm7, %v1050_v38 }
 0x594   :  { %v1836_v42 = vpop.eup %1835 }
 0x595   :  { %1710 = vmatmul.msk.f32.vlgmr.msra.gmra.mxu1 %vm505_vm7, %v1048_v30  ;;  %v698_v44 = vsel %vm558_vm8, %v1836_v42, 0.0 }
 0x596   :  { %1715 = vmatpush.xpose.msk.msrb.mxu1 %vm505_vm7, %v1180_v40  ;;  %699 = vadd.xlane.f32.xlu2 %v698_v44  ;;  %v914_v47 = vpop.f32.mrf.mxu0 }
 0x597   :  { %v2429_v56 = vadd.f32 %v2386_v8, %v914_v47 }
 0x599   :  { %v945_v60 = vsel %vm558_vm8, %v2429_v56, -inf }
 0x59a   :  { %1721 = vmatpush.xpose.msk.msra.mxu1 %vm505_vm7, %v1310_v43  ;;  %v652_v49 = vpop.f32.mrf.mxu2 }
 0x59b   :  { %v653_v51 = vadd.f32 %v2386_v8, %v652_v49 }
 0x59d   :  { %v683_v52 = vsel %vm558_vm8, %v653_v51, -inf }
 0x59e   :  { %684 = vmax.xlane.f32.xlu0 %v683_v52  ;;  %v1044_v53 = vpop.f32.mrf.mxu0 }
 0x59f   :  { %v2426_v54 = vadd.f32 %v2386_v8, %v1044_v53 }
 0x5a1   :  { %v1075_v57 = vsel %vm558_vm8, %v2426_v54, -inf }
 0x5a2   :  { %1076 = vmax.xlane.f32.xlu1 %v1075_v57 }
 0x5a6   :  { %946 = vmax.xlane.f32.xlu0 %v945_v60 }
 0x5ae   :  { %1149 = vrot.lane.b32.xlu2 %v2309_v39, %s2136_s2  ;;  %v948_v39 = vsel %vm558_vm8, %v2446_v0, -inf }
 0x5b6   :  { %1177 = vrot.lane.b32.xlu2 %v2305_v37, %s2136_s2 }
 0x5be   :  { %1411 = vrot.lane.b32.xlu2 %v2316_v45, %s2121_s24 }
 0x5c6   :  { %1439 = vrot.lane.b32.xlu2 %v2325_v48, %s2121_s24 }
 0x5ef   :  { %816 = vmax.xlane.f32.xlu2 %v815_v63 }
 0x5f7   :  { %949 = vmax.xlane.f32.xlu2 %v948_v39 }
 0x609   :  { %v700_v37 = vpop.xlane.xlu2 %699 }
 0x60a   :  { %1837 = vrcp.f32 %v700_v37 }
 0x610   :  { %v1838_v1 = vpop.eup %1837 }
 0x611   :  { %v704_v45 = vmul.f32 %v1838_v1, %v1836_v42  ;;  %v1150_v2 = vpop.permute.xlu2 %1149  ;;  %v685_v13 = vpop.xlane.xlu0 %684 }
 0x612   :  { %v1072_v3 = vpop.f32.mrf.mxu1  ;;  %1714 = vmatmul.msk.f32.vlgmr.msrb.gmra.mxu0 %vm505_vm7, %v1150_v2 }
 0x613   :  { %v2452_v48 = vadd.f32 %v2378_v58, %v1072_v3  ;;  %1694 = vmatmul.msk.f32.vlgmr.msra.gmra.mxu3 %vm558_vm8, %v704_v45 }
 0x615   :  { %v1078_v4 = vsel %vm558_vm8, %v2452_v48, -inf  ;;  %v1077_v39 = vpop.xlane.xlu1 %1076 }
 0x616   :  { %1079 = vmax.xlane.f32.xlu0 %v1078_v4  ;;  %v1081_v37 = vsub.f32 %v2426_v54, %v1077_v39 }
 0x618   :  { %v1083_v1 = vmul.f32 1.442695, %v1081_v37 }
 0x619   :  { %v1178_v6 = vpop.permute.xlu2 %1177  ;;  %v947_v30 = vpop.xlane.xlu0 %946 }
 0x61a   :  { %1716 = vmatmul.msk.f32.vlgmr.msrb.gmra.mxu1 %vm505_vm7, %v1178_v6  ;;  %1720 = vmatmul.msk.f32.vlgmr.msra.gmra.mxu0 %vm505_vm7, %v1280_v5  ;;  %v951_v35 = vsub.f32 %v2429_v56, %v947_v30 }
 0x61b   :  { %1698 = vmatmul.msk.f32.vlgmr.msrb.gmra.mxu3 %vm505_vm7, %v2381_v62  ;;  %v689_v62 = vsub.f32 %v653_v51, %v685_v13 }
 0x61c   :  { %v953_v38 = vmul.f32 1.442695, %v951_v35 }
 0x61d   :  { %v691_v17 = vmul.f32 1.442695, %v689_v62 }
 0x61f   :  { %1839 = vpow2.f32 %v691_v17 }
 0x621   :  { %v1412_v9 = vpop.permute.xlu2 %1411 }
 0x622   :  { %1722 = vmatmul.msk.f32.vlgmr.msra.gmra.mxu1 %vm505_vm7, %v1308_v7  ;;  %1725 = vmatpush.xpose.msk.msrb.mxu0 %vm505_vm7, %v1412_v9 }
 0x625   :  { %1726 = vmatmul.msk.f32.vlgmr.msrb.gmra.mxu0 %vm505_vm7, %v1410_v10  ;;  %v2481_v26 = vpop.eup %1839 }
 0x626   :  { %v695_v32 = vsel %vm558_vm8, %v2481_v26, 0.0 }
 0x629   :  { %v1440_v11 = vpop.permute.xlu2 %1439 }
 0x62a   :  { %1727 = vmatpush.xpose.msk.msrb.mxu1 %vm505_vm7, %v1440_v11 }
 0x62d   :  { %1728 = vmatmul.msk.f32.vlgmr.msrb.gmra.mxu1 %vm505_vm7, %v1438_v12 }
 0x662   :  { %v817_v22 = vpop.xlane.xlu2 %816 }
 0x663   :  { %v821_v25 = vsub.f32 %v785_v61, %v817_v22 }
 0x665   :  { %v823_v28 = vmul.f32 1.442695, %v821_v25 }
 0x667   :  { %1841 = vpow2.f32 %v823_v28 }
 0x668   :  { %1843 = vpow2.f32 %v953_v38 }
 0x66a   :  { %v950_v40 = vpop.xlane.xlu2 %949 }
 0x66d   :  { %v2496_v42 = vpop.eup %1841 }
 0x66e   :  { %v827_v47 = vsel %vm558_vm8, %v2496_v42, 0.0  ;;  %v2506_v52 = vpop.eup %1843 }
 0x66f   :  { %v957_v56 = vsel %vm558_vm8, %v2506_v52, 0.0 }
 0x689   :  { %v1080_v45 = vpop.xlane.xlu0 %1079 }
 0x68f   :  { %v1174_v14 = vpop.f32.mrf.mxu0 }
 0x690   :  { %v2467_v15 = vadd.f32 %v2386_v8, %v1174_v14 }
 0x692   :  { %v1205_v16 = vsel %vm558_vm8, %v2467_v15, -inf }
 0x693   :  { %1206 = vmax.xlane.f32.xlu2 %v1205_v16 }
 0x696   :  { %v2508_v53 = vpop.f32.mrf.mxu3 }
 0x697   :  { %v1202_v18 = vpop.f32.mrf.mxu1  ;;  %v1304_v19 = vpop.f32.mrf.mxu0 }
 0x698   :  { %v2472_v20 = vadd.f32 %v2378_v58, %v1202_v18  ;;  %v2475_v59 = vadd.f32 %v2386_v8, %v1304_v19 }
 0x69a   :  { %v1208_v23 = vsel %vm558_vm8, %v2472_v20, -inf  ;;  %v1335_v24 = vsel %vm558_vm8, %v2475_v59, -inf }
 0x69b   :  { %1209 = vmax.xlane.f32.xlu1 %v1208_v23  ;;  %1336 = vmax.xlane.f32.xlu0 %v1335_v24 }
 0x69e   :  { %v812_v61 = vpop.f32.mrf.mxu3 }
 0x69f   :  { %v1332_v27 = vpop.f32.mrf.mxu1  ;;  %v2519_v63 = vadd.f32 %v2378_v58, %v812_v61 }
 0x6a0   :  { %v2484_v29 = vadd.f32 %v2378_v58, %v1332_v27 }
 0x6a2   :  { %v1434_v31 = vpop.f32.mrf.mxu0  ;;  %v1338_v33 = vsel %vm558_vm8, %v2484_v29, -inf }
 0x6a3   :  { %v2491_v34 = vadd.f32 %v2386_v8, %v1434_v31  ;;  %696 = vadd.xlane.f32.xlu0 %v695_v32  ;;  %1339 = vmax.xlane.f32.xlu2 %v1338_v33  ;;  %v952_v8 = vsub.f32 %v2446_v0, %v950_v40  ;;  %v818_v0 = vsel %vm558_vm8, %v2519_v63, -inf }
 0x6a5   :  { %v1465_v36 = vsel %vm558_vm8, %v2491_v34, -inf  ;;  %v955_v51 = vmul.f32 1.442695, %v952_v8 }
 0x6a6   :  { %1466 = vmax.xlane.f32.xlu1 %v1465_v36 }
 0x6a7   :  { %1845 = vpow2.f32 %v955_v51 }
 0x6a8   :  { %1847 = vpow2.f32 %v1083_v1 }
 0x6aa   :  { %v1462_v43 = vpop.f32.mrf.mxu1 }
 0x6ab   :  { %v2499_v44 = vadd.f32 %v2378_v58, %v1462_v43  ;;  %v1082_v58 = vsub.f32 %v2452_v48, %v1080_v45 }
 0x6ad   :  { %v1468_v49 = vsel %vm558_vm8, %v2499_v44, -inf  ;;  %v2514_v57 = vpop.eup %1845  ;;  %v1085_v4 = vmul.f32 1.442695, %v1082_v58 }
 0x6ae   :  { %828 = vadd.xlane.f32.xlu1 %v827_v47  ;;  %1469 = vmax.xlane.f32.xlu2 %v1468_v49  ;;  %v960_v60 = vsel %vm558_vm8, %v2514_v57, 0.0  ;;  %v2530_v2 = vpop.eup %1847 }
 0x6af   :  { %v1087_v3 = vsel %vm558_vm8, %v2530_v2, 0.0  ;;  %1849 = vpow2.f32 %v1085_v4 }
 0x6b5   :  { %v2537_v5 = vpop.eup %1849 }
 0x6b6   :  { %958 = vadd.xlane.f32.xlu1 %v957_v56  ;;  %v1090_v54 = vsel %vm558_vm8, %v2537_v5, 0.0 }
 0x6b7   :  { %706 = vrot.lane.b32.xlu0 %v2318_v46, %s2133_s16 }
 0x6be   :  { %961 = vadd.xlane.f32.xlu1 %v960_v60 }
 0x6c6   :  { %819 = vmax.xlane.f32.xlu1 %v818_v0  ;;  %1769 = vrot.lane.b32.xlu2 %v2523_v55, %s2134_s10 }
 0x6df   :  { %1774 = vrot.lane.b32.xlu1 %v2523_v55, %s2135_s12 }
 0x6e1   :  { %1088 = vadd.xlane.f32.xlu0 %v1087_v3 }
 0x6ef   :  { %1091 = vadd.xlane.f32.xlu2 %v1090_v54 }
 0x6f5   :  { %1779 = vrot.lane.b32.xlu0 %v2523_v55, %s2138_s22 }
 0x706   :  { %v1207_v6 = vpop.xlane.xlu2 %1206 }
 0x707   :  { %v1211_v48 = vsub.f32 %v2467_v15, %v1207_v6 }
 0x709   :  { %v1213_v7 = vmul.f32 1.442695, %v1211_v48 }
 0x70b   :  { %1851 = vpow2.f32 %v1213_v7 }
 0x70e   :  { %v1337_v9 = vpop.xlane.xlu0 %1336  ;;  %v1210_v10 = vpop.xlane.xlu1 %1209 }
 0x70f   :  { %v1341_v11 = vsub.f32 %v2475_v59, %v1337_v9  ;;  %v1212_v12 = vsub.f32 %v2472_v20, %v1210_v10 }
 0x711   :  { %v2546_v13 = vpop.eup %1851  ;;  %v1343_v14 = vmul.f32 1.442695, %v1341_v11  ;;  %v1215_v62 = vmul.f32 1.442695, %v1212_v12 }
 0x712   :  { %v1217_v16 = vsel %vm558_vm8, %v2546_v13, 0.0 }
 0x713   :  { %1218 = vadd.xlane.f32.xlu1 %v1217_v16  ;;  %1853 = vpow2.f32 %v1215_v62 }
 0x714   :  { %1855 = vpow2.f32 %v1343_v14 }
 0x716   :  { %v1340_v17 = vpop.xlane.xlu2 %1339  ;;  %v697_v24 = vpop.xlane.xlu0 %696 }
 0x717   :  { %v1342_v15 = vsub.f32 %v2484_v29, %v1340_v17 }
 0x719   :  { %v1345_v18 = vmul.f32 1.442695, %v1342_v15  ;;  %v1467_v19 = vpop.xlane.xlu1 %1466  ;;  %v2551_v22 = vpop.eup %1853 }
 0x71a   :  { %v1471_v59 = vsub.f32 %v2491_v34, %v1467_v19  ;;  %v2554_v20 = vpop.eup %1855  ;;  %v1220_v23 = vsel %vm558_vm8, %v2551_v22, 0.0 }
 0x71b   :  { %1857 = vpow2.f32 %v1345_v18  ;;  %1221 = vadd.xlane.f32.xlu2 %v1220_v23  ;;  %v1347_v27 = vsel %vm558_vm8, %v2554_v20, 0.0 }
 0x71c   :  { %v1473_v25 = vmul.f32 1.442695, %v1471_v59  ;;  %1859 = vrcp.f32 %v697_v24 }
 0x71e   :  { %1861 = vpow2.f32 %v1473_v25 }
 0x71f   :  { %1348 = vadd.xlane.f32.xlu0 %v1347_v27 }
 0x721   :  { %v2560_v28 = vpop.eup %1857  ;;  %v1470_v29 = vpop.xlane.xlu2 %1469 }
 0x722   :  { %v829_v30 = vpop.xlane.xlu1 %828  ;;  %v1350_v31 = vsel %vm558_vm8, %v2560_v28, 0.0  ;;  %v1860_v32 = vpop.eup %1859  ;;  %v1472_v4 = vsub.f32 %v2499_v44, %v1470_v29 }
 0x723   :  { %1351 = vadd.xlane.f32.xlu1 %v1350_v31  ;;  %1863 = vrcp.f32 %v829_v30  ;;  %v703_v34 = vmul.f32 %v1860_v32, %v2481_v26 }
 0x724   :  { %v2564_v33 = vpop.eup %1861 }
 0x725   :  { %v1477_v8 = vsel %vm558_vm8, %v2564_v33, 0.0 }
 0x729   :  { %v707_v35 = vpop.permute.xlu0 %706  ;;  %v1770_v36 = vpop.permute.xlu2 %1769 }
 0x72a   :  { %v1772_v38 = vunpack.i.h.bf16 %v1770_v36  ;;  %v1771_v40 = vunpack.i.l.bf16 %v1770_v36  ;;  %v959_v43 = vpop.xlane.xlu1 %958  ;;  %727 = vmatpush.msra.mxu2 %v707_v35  ;;  %v1864_v47 = vpop.eup %1863 }
 0x72b   :  { %1693 = vmatmul.msk.f32.vlgmr.msra.gmra.mxu2 %vm558_vm8, %v703_v34  ;;  %1478 = vadd.xlane.f32.xlu1 %v1477_v8  ;;  %v835_v49 = vmul.f32 %v1864_v47, %v2496_v42 }
 0x72c   :  { %858 = vmatpush.msrb.mxu2 %v1771_v40  ;;  %884 = vmatpush.msra.mxu3 %v1772_v38 }
 0x732   :  { %v962_v51 = vpop.xlane.xlu1 %961 }
 0x733   :  { %1487 = vrot.lane.b32.xlu0 %v2318_v46, %s2121_s24  ;;  %1699 = vmatmul.msk.f32.vlgmr.msrb.gmra.mxu2 %vm558_vm8, %v835_v49 }
 0x73a   :  { %v820_v26 = vpop.xlane.xlu1 %819 }
 0x73b   :  { %v822_v56 = vsub.f32 %v2519_v63, %v820_v26 }
 0x73d   :  { %v825_v60 = vmul.f32 1.442695, %v822_v56 }
 0x73f   :  { %1865 = vpow2.f32 %v825_v60 }
 0x740   :  { %1867 = vrcp.f32 %v959_v43 }
 0x744   :  { %1789 = vrot.lane.b32.xlu1 %v2523_v55, %s2137_s3 }
 0x745   :  { %v1866_v61 = vpop.eup %1865 }
 0x746   :  { %v830_v0 = vsel %vm558_vm8, %v1866_v61, 0.0  ;;  %v1868_v42 = vpop.eup %1867 }
 0x747   :  { %831 = vadd.xlane.f32.xlu2 %v830_v0  ;;  %v965_v1 = vmul.f32 %v1868_v42, %v2506_v52  ;;  %v1475_v52 = vmul.f32 1.442695, %v1472_v4  ;;  %v1624_v4 = vld [vmem:[#allocation14 + $0x48] sm:$0xff] }
 0x74c   :  { %1513 = vrot.lane.b32.xlu1 %v2333_v50, %s2121_s24 }
 0x751   :  { %v1775_v46 = vpop.permute.xlu1 %1774 }
 0x752   :  { %v1777_v39 = vunpack.i.h.bf16 %v1775_v46  ;;  %v1776_v37 = vunpack.i.l.bf16 %v1775_v46 }
 0x754   :  { %988 = vmatpush.msra.mxu2 %v1776_v37  ;;  %1014 = vmatpush.msrb.mxu3 %v1777_v39  ;;  %v1089_v63 = vpop.xlane.xlu0 %1088  ;;  %v1630_v37 = vld [vmem:[#allocation14 + $0x78] sm:$0xff] }
 0x755   :  { %1705 = vmatmul.msk.f32.vlgmr.msra.gmra.mxu2 %vm558_vm8, %v965_v1  ;;  %1869 = vrcp.f32 %v1089_v63  ;;  %v1629_v1 = vld [vmem:[#allocation14 + $0x70] sm:$0xff]  ;;  %1635 = vmatpush.msra.mxu0 %v1630_v37  ;;  %v1628_v63 = vld [vmem:[#allocation14 + $0x68] sm:$0xff] }
 0x756   :  { %1871 = vpow2.f32 %v1475_v52  ;;  %v1623_v52 = vld [vmem:[#allocation14 + $0x40] sm:$0xff] }
 0x757   :  { %1636 = vmatpush.msra.mxu0 %v1629_v1 }
 0x759   :  { %1637 = vmatpush.msra.mxu0 %v1628_v63 }
 0x75b   :  { %v1870_v45 = vpop.eup %1869 }
 0x75c   :  { %v1095_v50 = vmul.f32 %v1870_v45, %v2530_v2  ;;  %v2587_v54 = vpop.eup %1871 }
 0x75d   :  { %v1480_v6 = vsel %vm558_vm8, %v2587_v54, 0.0 }
 0x75f   :  { %1784 = vrot.lane.b32.xlu2 %v2523_v55, %s2136_s2 }
 0x762   :  { %v1092_v48 = vpop.xlane.xlu2 %1091 }
 0x767   :  { %v1780_v58 = vpop.permute.xlu0 %1779 }
 0x768   :  { %v1781_v3 = vunpack.i.l.bf16 %v1780_v58  ;;  %v1782_v18 = vunpack.i.h.bf16 %v1780_v58  ;;  %v1627_v58 = vld [vmem:[#allocation14 + $0x60] sm:$0xff] }
 0x769   :  { %1638 = vmatpush.msra.mxu0 %v1627_v58 }
 0x76a   :  { %1118 = vmatpush.msrb.mxu2 %v1781_v3  ;;  %v1626_v3 = vld [vmem:[#allocation14 + $0x58] sm:$0xff] }
 0x76b   :  { %1711 = vmatmul.msk.f32.vlgmr.msrb.gmra.mxu2 %vm558_vm8, %v1095_v50  ;;  %v1625_v50 = vld [vmem:[#allocation14 + $0x50] sm:$0xff]  ;;  %1639 = vmatpush.msra.mxu0 %v1626_v3 }
 0x76d   :  { %1640 = vmatpush.msra.mxu0 %v1625_v50 }
 0x76f   :  { %1641 = vmatpush.msra.mxu0 %v1624_v4 }
 0x771   :  { %1642 = vmatpush.msra.mxu0 %v1623_v52 }
 0x786   :  { %v1219_v55 = vpop.xlane.xlu1 %1218 }
 0x787   :  { %1873 = vrcp.f32 %v1219_v55  ;;  %v1620_v55 = vld [vmem:[#allocation14 + $0x28] sm:$0xff] }
 0x788   :  { %1481 = vadd.xlane.f32.xlu2 %v1480_v6  ;;  %v1621_v6 = vld [vmem:[#allocation14 + $0x30] sm:$0xff] }
 0x78d   :  { %v1874_v14 = vpop.eup %1873 }
 0x78e   :  { %v1222_v2 = vpop.xlane.xlu2 %1221 }
 0x792   :  { %v1349_v12 = vpop.xlane.xlu0 %1348 }
 0x796   :  { %v1352_v10 = vpop.xlane.xlu1 %1351 }
 0x79e   :  { %v1479_v11 = vpop.xlane.xlu1 %1478 }
 0x7a5   :  { %v1488_v24 = vpop.permute.xlu0 %1487 }
 0x7ae   :  { %v729_v7 = vpop.f32.mrf.mxu2 }
 0x7af   :  { %v1793_v9 = vpack.i.bf16 %v2508_v53, %v729_v7  ;;  %v1225_v53 = vmul.f32 %v1874_v14, %v2546_v13  ;;  %v1618_v7 = vld [vmem:[#allocation14 + $0x18] sm:$0xff] }
 0x7b1   :  { %1794 = vrot.lane.b32.xlu1 %v1793_v9, %s2121_s24  ;;  %v1617_v9 = vld [vmem:[#allocation14 + $0x10] sm:$0xff] }
 0x7b6   :  { %v1790_v16 = vpop.permute.xlu1 %1789  ;;  %v860_v8 = vpop.f32.mrf.mxu2 }
 0x7b7   :  { %v1791_v59 = vunpack.i.l.bf16 %v1790_v16  ;;  %v1792_v34 = vunpack.i.h.bf16 %v1790_v16 }
 0x7ba   :  { %v832_v44 = vpop.xlane.xlu2 %831 }
 0x7bb   :  { %1875 = vrcp.f32 %v832_v44 }
 0x7bc   :  { %1877 = vrcp.f32 %v962_v51 }
 0x7bd   :  { %1879 = vrcp.f32 %v1349_v12 }
 0x7be   :  { %1881 = vrcp.f32 %v1092_v48  ;;  %v1514_v36 = vpop.permute.xlu1 %1513  ;;  %v1619_v48 = vld [vmem:[#allocation14 + $0x20] sm:$0xff] }
 0x7bf   :  { %1883 = vrcp.f32 %v1479_v11 }
 0x7c0   :  { %1885 = vrcp.f32 %v1222_v2  ;;  %v1615_v2 = vld [vmem:[#allocation14] sm:$0xff] }
 0x7c1   :  { %v1876_v62 = vpop.eup %1875  ;;  %1887 = vrcp.f32 %v1352_v10  ;;  %v1616_v10 = vld [vmem:[#allocation14 + $0x8] sm:$0xff] }
 0x7c2   :  { %v836_v17 = vmul.f32 %v1876_v62, %v1866_v61  ;;  %v1785_v15 = vpop.permute.xlu2 %1784  ;;  %v1878_v23 = vpop.eup %1877 }
 0x7c3   :  { %v1786_v19 = vunpack.i.l.bf16 %v1785_v15  ;;  %v1880_v25 = vpop.eup %1879  ;;  %v966_v27 = vmul.f32 %v1878_v23, %v2514_v57  ;;  %v1787_v29 = vunpack.i.h.bf16 %v1785_v15 }
 0x7c4   :  { %1700 = vmatmul.msk.f32.vlgmr.msra.gmra.mxu3 %vm558_vm8, %v836_v17  ;;  %v1355_v30 = vmul.f32 %v1880_v25, %v2554_v20  ;;  %v1882_v13 = vpop.eup %1881 }
 0x7c5   :  { %1144 = vmatpush.msra.mxu3 %v1782_v18  ;;  %1248 = vmatpush.msra.mxu2 %v1786_v19  ;;  %v1884_v31 = vpop.eup %1883  ;;  %v1096_v32 = vmul.f32 %v1882_v13, %v2537_v5 }
 0x7c6   :  { %1717 = vmatmul.msk.f32.vlgmr.msra.gmra.mxu2 %vm558_vm8, %v1225_v53  ;;  %v1485_v35 = vmul.f32 %v1884_v31, %v2564_v33  ;;  %v1886_v57 = vpop.eup %1885 }
 0x7c7   :  { %1378 = vmatpush.msrb.mxu2 %v1791_v59  ;;  %v1226_v20 = vmul.f32 %v1886_v57, %v2551_v22  ;;  %v1888_v38 = vpop.eup %1887 }
 0x7c8   :  { %v1356_v40 = vmul.f32 %v1888_v38, %v2560_v28 }
 0x7c9   :  { %1508 = vmatpush.msra.mxu2 %v1488_v24 }
 0x7cc   :  { %1706 = vmatmul.msk.f32.vlgmr.msrb.gmra.mxu3 %vm558_vm8, %v966_v27 }
 0x7cd   :  { %1274 = vmatpush.msrb.mxu3 %v1787_v29 }
 0x7ce   :  { %1723 = vmatmul.msk.f32.vlgmr.msrb.gmra.mxu2 %vm558_vm8, %v1355_v30 }
 0x7d4   :  { %1712 = vmatmul.msk.f32.vlgmr.msra.gmra.mxu3 %vm558_vm8, %v1096_v32 }
 0x7d5   :  { %1404 = vmatpush.msra.mxu3 %v1792_v34 }
 0x7d6   :  { %1729 = vmatmul.msk.f32.vlgmr.msra.gmra.mxu2 %vm558_vm8, %v1485_v35 }
 0x7d8   :  { %v990_v47 = vpop.f32.mrf.mxu2 }
 0x7dc   :  { %1718 = vmatmul.msk.f32.vlgmr.msrb.gmra.mxu3 %vm558_vm8, %v1226_v20 }
 0x7dd   :  { %1534 = vmatpush.msrb.mxu3 %v1514_v36 }
 0x7e4   :  { %1724 = vmatmul.msk.f32.vlgmr.msra.gmra.mxu3 %vm558_vm8, %v1356_v40 }
 0x7ee   :  { %v1120_v49 = vpop.f32.mrf.mxu2 }
 0x7fb   :  { %v1482_v5 = vpop.xlane.xlu2 %1481 }
 0x7fc   :  { %1889 = vrcp.f32 %v1482_v5 }
 0x802   :  { %v1890_v33 = vpop.eup %1889 }
 0x803   :  { %v1486_v43 = vmul.f32 %v1890_v33, %v2587_v54  ;;  %v1622_v54 = vld [vmem:[#allocation14 + $0x38] sm:$0xff] }
 0x804   :  { %1643 = vmatpush.msra.mxu0 %v1622_v54 }
 0x805   :  { %1730 = vmatmul.msk.f32.vlgmr.msrb.gmra.mxu3 %vm558_vm8, %v1486_v43 }
 0x806   :  { %1644 = vmatpush.msra.mxu0 %v1621_v6 }
 0x808   :  { %1645 = vmatpush.msra.mxu0 %v1620_v55 }
 0x80a   :  { %1646 = vmatpush.msra.mxu0 %v1619_v48 }
 0x80c   :  { %1647 = vmatpush.msra.mxu0 %v1618_v7 }
 0x80e   :  { %1648 = vmatpush.msra.mxu0 %v1617_v9 }
 0x810   :  { %1649 = vmatpush.msra.mxu0 %v1616_v10 }
 0x812   :  { %1650 = vmatpush.msra.mxu0 %v1615_v2 }
 0x823   :  { %v1795_v11 = vpop.permute.xlu1 %1794 }
 0x824   :  { %v1796_v12 = vunpack.i.l.bf16 %v1795_v11  ;;  %v1797_v30 = vunpack.i.h.bf16 %v1795_v11 }
 0x826   :  { %v1595_v15 = vsel %vm505_vm7, %v2416_v41, %v1796_v12  ;;  %v1596_v34 = vsel %vm505_vm7, %v2399_v21, %v1797_v30  ;;  %v1820_v21 = vld [vmem:[%s2658_s14] ss:$0 sm:$0xff] }
 0x847   :  { %v886_v22 = vpop.f32.mrf.mxu3 }
 0x848   :  { %v1798_v51 = vpack.i.bf16 %v886_v22, %v860_v8 }
 0x849   :  { %v1250_v26 = vpop.f32.mrf.mxu2 }
 0x84a   :  { %1799 = vrot.lane.b32.xlu0 %v1798_v51, %s2137_s3 }
 0x84f   :  { %v1016_v56 = vpop.f32.mrf.mxu3 }
 0x850   :  { %v1803_v60 = vpack.i.bf16 %v1016_v56, %v990_v47 }
 0x851   :  { %v1380_v28 = vpop.f32.mrf.mxu2 }
 0x852   :  { %1804 = vrot.lane.b32.xlu1 %v1803_v60, %s2136_s2  ;;  %1573 = vrot.lane.b32.xlu0 %v1250_v26, %s2135_s12 }
 0x857   :  { %v1146_v61 = vpop.f32.mrf.mxu3 }
 0x858   :  { %v1808_v0 = vpack.i.bf16 %v1146_v61, %v1120_v49 }
 0x859   :  { %v1510_v42 = vpop.f32.mrf.mxu2 }
 0x85a   :  { %1809 = vrot.lane.b32.xlu2 %v1808_v0, %s2138_s22  ;;  %1581 = vrot.lane.b32.xlu1 %v1380_v28, %s2134_s10 }
 0x85b   :  { %1589 = vrot.lane.b32.xlu0 %v1510_v42, %s2133_s16 }
 0x85f   :  { %v1276_v46 = vpop.f32.mrf.mxu3 }
 0x862   :  { %1575 = vrot.lane.b32.xlu1 %v1276_v46, %s2135_s12 }
 0x867   :  { %v1406_v39 = vpop.f32.mrf.mxu3 }
 0x868   :  { %1583 = vrot.lane.b32.xlu0 %v1406_v39, %s2134_s10 }
 0x888   :  { %v1536_v45 = vpop.f32.mrf.mxu3 }
 0x889   :  { %1591 = vrot.lane.b32.xlu1 %v1536_v45, %s2133_s16 }
 0x8b4   :  { %v1810_v62 = vpop.permute.xlu2 %1809 }
 0x8b5   :  { %v1811_v53 = vunpack.i.l.bf16 %v1810_v62  ;;  %v1812_v20 = vunpack.i.h.bf16 %v1810_v62 }
 0x8bc   :  { %v1800_v44 = vpop.permute.xlu0 %1799 }
 0x8bd   :  { %v1801_v14 = vunpack.i.l.bf16 %v1800_v44  ;;  %v1802_v13 = vunpack.i.h.bf16 %v1800_v44 }
 0x8bf   :  { %v1598_v19 = vsel %vm1597_vm9, %v1595_v15, %v1801_v14  ;;  %v1599_v35 = vsel %vm1597_vm9, %v1596_v34, %v1802_v13 }
 0x8c4   :  { %v1805_v16 = vpop.permute.xlu1 %1804  ;;  %v1574_v17 = vpop.permute.xlu0 %1573 }
 0x8c5   :  { %v1806_v18 = vunpack.i.l.bf16 %v1805_v16  ;;  %v1807_v31 = vunpack.i.h.bf16 %v1805_v16 }
 0x8c7   :  { %v1601_v59 = vsel %vm1600_vm10, %v1598_v19, %v1806_v18  ;;  %v1602_v57 = vsel %vm1600_vm10, %v1599_v35, %v1807_v31 }
 0x8c8   :  { %v1604_v23 = vsel %vm1603_vm11, %v1601_v59, %v1811_v53  ;;  %v1605_v38 = vsel %vm1603_vm11, %v1602_v57, %v1812_v20 }
 0x8c9   :  { %v1607_v24 = vsel %vm1606_vm12, %v1604_v23, %v1574_v17 }
 0x8cc   :  { %v1582_v25 = vpop.permute.xlu1 %1581 }
 0x8cd   :  { %v1610_v27 = vsel %vm1609_vm13, %v1607_v24, %v1582_v25  ;;  %v1590_v29 = vpop.permute.xlu0 %1589 }
 0x8ce   :  { %v1613_v41 = vsel %vm1612_vm14, %v1610_v27, %v1590_v29 }
 0x8cf   :  { %1651 = vmatmul.f32.vlgmr.msra.gmra.mxu0 %v1613_v41 }
 0x8d4   :  { %v1576_v32 = vpop.permute.xlu1 %1575 }
 0x8d5   :  { %v1608_v40 = vsel %vm1606_vm12, %v1605_v38, %v1576_v32 }
 0x8da   :  { %v1584_v36 = vpop.permute.xlu0 %1583 }
 0x8db   :  { %v1611_v5 = vsel %vm1609_vm13, %v1608_v40, %v1584_v36 }
 0x8fb   :  { %v1592_v33 = vpop.permute.xlu1 %1591 }
 0x8fc   :  { %v1614_v43 = vsel %vm1612_vm14, %v1611_v5, %v1592_v33 }
 0x8fd   :  { %1654 = vmatmul.f32.gmra.mxu0 %v1614_v43 }
 0x94c   :  { %v1652_v8 = vpop.f32.mrf.mxu0 }
 0x94d   :  { %v1653_v47 = vadd.f32 %v1820_v21, %v1652_v8 }
 0x94f   :  { %1658 = vst [vmem:[#allocation16] sm:$0xff] %v1653_v47 }
 0x97a   :  { %v1655_v49 = vpop.f32.mrf.mxu0 }
 0x97b   :  { %v1656_v22 = vadd.f32 %v1820_v21, %v1655_v49 }
 0x97d   :  { %1659 = vst [vmem:[#allocation16 + $0x8] sm:$0xff] %v1656_v22 }
 0x97e   :  { %1672 = dma.vmem_to_hbm [thread:$0]  %s1665_s7, 256, %s1667_s28, [#allocation4], %s2123_s17, %s2123_s17, %s2124_s18  }
 0x97f   :  { %2117 = dma.done.wait [#allocation4], 256  }
 0x980   :  { %2118 = vsyncadd [#allocation4], 4294967040 }
 0x981   :  { %1677 = vsyncpa [#allocation3], 1 }
 0x982   :  { %1678 = vsyncpa [#allocation6], 1 }
 0x983   :  { %1679 = vsyncpa [#allocation9], 1 }
 0x984   :  { %1680 = vsyncpa [#allocation12], 1 }
 0x985   :  { %1681 = vsyncpa [#allocation15], 1 }
 0x986   :  { %1682 = vsyncpa [#allocation4], 1 }

</bundles_post_ra>
